<compile_context>
chip_gen: v7x
topology: tpu7x:2x2x1
jax: 0.10.0
libtpu: 0.0.40
codegen_flags: <defaults>
</compile_context>

<pallas_src>
import math

import jax
import jax.numpy as jnp
from jax.experimental import pallas as pl
from jax.experimental.pallas import tpu as pltpu


# ---------------------------------------------------------------------------
# Fused decoder kernel (one batch row per grid step).
# PyTorch GRU gate order: [r, z, n]
#   r = sigmoid(W_ir x + b_ir + W_hr h + b_hr)
#   z = sigmoid(W_iz x + b_iz + W_hz h + b_hz)
#   n = tanh  (W_in x + b_in + r * (W_hn h + b_hn))
#   h = (1 - z) * n + z * h
# Then attention + output head:
#   scores  = (dec . enc^T) / sqrt(D) -> softmax over encoder seq
#   context = weights @ enc
#   mask    = (dec[:, 0] != 0)
#   attn    = tanh(dec @ W1^T + context @ W2^T + b_attn) * mask
#   logits  = (attn @ Wout^T + b_out) * mask
# ---------------------------------------------------------------------------
def _make_decoder_kernel(num_layers, inv_sqrt_d):
    L = num_layers

    def kernel(x_ref, h0_ref, enc_ref, enct_ref,
               wih_ref, whh_ref, bih_ref, bhh_ref,
               w1_ref, w2_ref, battn_ref, wout_ref, bout_ref,
               logits_ref, hn_ref, attnw_ref,
               y_scr, gx_scr):
        S = x_ref.shape[1]
        D = x_ref.shape[2]
        Se = enc_ref.shape[1]
        V = wout_ref.shape[1]

        h0_all = h0_ref[...].reshape(L, D)          # (1,L,D) -> (L,D), free squeeze

        # ---------------- fused multi-layer GRU ----------------
        h_finals = []
        for l in range(L):                          # static unroll over layers
            # layer input: embeddings for layer 0, previous layer's output otherwise
            x2d = x_ref[...].reshape(S, D) if l == 0 else y_scr[...]   # (S, D)

            # hoisted input-gate matmul for the WHOLE sequence (single MXU call)
            gx_scr[...] = (jnp.dot(x2d, wih_ref[l],
                                   preferred_element_type=jnp.float32)
                           + bih_ref[l])            # (S, 3D)

            whh_l = whh_ref[l]                      # (D, 3D) pre-transposed
            bhh_l = bhh_ref[l]                      # (1, 3D)

            def step(t, h):                         # h: (1, D)
                gx_t = gx_scr[pl.ds(t, 1), :]       # (1, 3D) precomputed input gates
                gh = jnp.dot(h, whh_l, preferred_element_type=jnp.float32) + bhh_l
                r = jax.nn.sigmoid(gx_t[:, :D] + gh[:, :D])
                z = jax.nn.sigmoid(gx_t[:, D:2 * D] + gh[:, D:2 * D])
                n = jnp.tanh(gx_t[:, 2 * D:] + r * gh[:, 2 * D:])
                h_new = (1.0 - z) * n + z * h
                y_scr[pl.ds(t, 1), :] = h_new
                return h_new

            h_fin = jax.lax.fori_loop(0, S, step, h0_all[l:l + 1, :])
            h_finals.append(h_fin)

        hn_ref[...] = jnp.concatenate(h_finals, axis=0).reshape(1, L, D)

        # ---------------- attention + output head ----------------
        dec = y_scr[...]                            # (S, D) final GRU layer output
        enc = enc_ref[...].reshape(Se, D)           # (Se, D)
        enc_t = enct_ref[...].reshape(D, Se)        # (D, Se) pre-transposed on host

        scores = jnp.dot(dec, enc_t,
                         preferred_element_type=jnp.float32) * inv_sqrt_d  # (S, Se)
        m = jnp.max(scores, axis=-1, keepdims=True)
        e = jnp.exp(scores - m)
        denom = jnp.sum(e, axis=-1, keepdims=True)
        weights = e * pl.reciprocal(denom, approx=True)                    # (S, Se)
        context = jnp.dot(weights, enc,
                          preferred_element_type=jnp.float32)              # (S, D)

        mask = jnp.where(dec[:, 0:1] != 0.0, 1.0, 0.0)                     # (S, 1)

        pre = (jnp.dot(dec, w1_ref[...], preferred_element_type=jnp.float32)
               + jnp.dot(context, w2_ref[...], preferred_element_type=jnp.float32)
               + battn_ref[...])                                           # (S, D)
        attn_masked = jnp.tanh(pre) * mask

        logits = (jnp.dot(attn_masked, wout_ref[...],
                          preferred_element_type=jnp.float32)
                  + bout_ref[...]) * mask                                  # (S, V)

        logits_ref[...] = logits.reshape(1, S, V).astype(logits_ref.dtype)
        attnw_ref[...] = weights.reshape(1, S, Se).astype(attnw_ref.dtype)

    return kernel


# ---------------------------------------------------------------------------
# Full Decoder forward (single fused pallas_call).
# ---------------------------------------------------------------------------
def decoder_forward(params, padded_seqs, seq_lengths, encoder_padded_seqs,
                    hidden_states):
    """padded_seqs: int token ids (B, Sd); encoder_padded_seqs: (B, Se, D);
    hidden_states: (L, B, D).  Returns (logits, new_hidden, attention_weights).
    seq_lengths is unused by this scaffold forward (matches the PyTorch code)."""
    del seq_lengths
    # Embedding gather (glue) + Dropout (eval -> identity).
    emb = jnp.take(params['embedding'], padded_seqs, axis=0)      # (B, S, D)
    B, S, D = emb.shape
    Se = encoder_padded_seqs.shape[1]
    L = len(params['gru'])
    V = params['w_out'].shape[0]

    # Pre-transpose / stack weights on the host (trace time, free in XLA).
    wih_t = jnp.stack([w.T for (w, _, _, _) in params['gru']], axis=0)         # (L, D, 3D)
    whh_t = jnp.stack([w.T for (_, w, _, _) in params['gru']], axis=0)         # (L, D, 3D)
    bih = jnp.stack([b.reshape(1, -1) for (_, _, b, _) in params['gru']], 0)   # (L, 1, 3D)
    bhh = jnp.stack([b.reshape(1, -1) for (_, _, _, b) in params['gru']], 0)   # (L, 1, 3D)

    h0_bld = jnp.transpose(hidden_states, (1, 0, 2))              # (B, L, D)
    enc = encoder_padded_seqs                                     # (B, Se, D)
    enc_t = jnp.transpose(enc, (0, 2, 1))                         # (B, D, Se)

    w1_t = params['w_attn'][:, :D].T                              # (D, D) decoder half
    w2_t = params['w_attn'][:, D:].T                              # (D, D) context half
    battn = params['b_attn'].reshape(1, -1)                       # (1, D)
    wout_t = params['w_out'].T                                    # (D, V)
    bout = params['b_out'].reshape(1, -1)                         # (1, V)

    kernel = _make_decoder_kernel(L, 1.0 / math.sqrt(D))

    logits, hn_bld, attn_w = pl.pallas_call(
        kernel,
        grid=(B,),
        in_specs=[
            pl.BlockSpec((1, S, D), lambda b: (b, 0, 0)),          # emb
            pl.BlockSpec((1, L, D), lambda b: (b, 0, 0)),          # h0 (batch-major)
            pl.BlockSpec((1, Se, D), lambda b: (b, 0, 0)),         # enc
            pl.BlockSpec((1, D, Se), lambda b: (b, 0, 0)),         # enc^T
            pl.BlockSpec((L, D, 3 * D), lambda b: (0, 0, 0)),      # W_ih^T stacked
            pl.BlockSpec((L, D, 3 * D), lambda b: (0, 0, 0)),      # W_hh^T stacked
            pl.BlockSpec((L, 1, 3 * D), lambda b: (0, 0, 0)),      # b_ih stacked
            pl.BlockSpec((L, 1, 3 * D), lambda b: (0, 0, 0)),      # b_hh stacked
            pl.BlockSpec((D, D), lambda b: (0, 0)),                # attn W1^T
            pl.BlockSpec((D, D), lambda b: (0, 0)),                # attn W2^T
            pl.BlockSpec((1, D), lambda b: (0, 0)),                # attn bias
            pl.BlockSpec((D, V), lambda b: (0, 0)),                # W_out^T
            pl.BlockSpec((1, V), lambda b: (0, 0)),                # b_out
        ],
        out_specs=(
            pl.BlockSpec((1, S, V), lambda b: (b, 0, 0)),          # logits
            pl.BlockSpec((1, L, D), lambda b: (b, 0, 0)),          # hn (batch-major)
            pl.BlockSpec((1, S, Se), lambda b: (b, 0, 0)),         # attention weights
        ),
        out_shape=(
            jax.ShapeDtypeStruct((B, S, V), jnp.float32),
            jax.ShapeDtypeStruct((B, L, D), jnp.float32),
            jax.ShapeDtypeStruct((B, S, Se), jnp.float32),
        ),
        scratch_shapes=[
            pltpu.VMEM((S, D), jnp.float32),        # GRU layer activations (kept resident)
            pltpu.VMEM((S, 3 * D), jnp.float32),    # hoisted input-gate pre-activations
        ],
        compiler_params=pltpu.CompilerParams(
            dimension_semantics=("parallel",),      # batch rows independent -> 2 TCs on v7x
            vmem_limit_bytes=32 * 1024 * 1024),
    )(emb, h0_bld, enc, enc_t, wih_t, whh_t, bih, bhh,
      w1_t, w2_t, battn, wout_t, bout)

    new_hidden = jnp.transpose(hn_bld, (1, 0, 2))                  # back to (L, B, D)
    return logits, new_hidden, attn_w


# ---------------------------------------------------------------------------
# Pure-JAX reference (for a correctness sanity check).
# ---------------------------------------------------------------------------
def decoder_forward_ref(params, padded_seqs, encoder_padded_seqs, hidden_states):
    D = params['embedding'].shape[1]
    x = jnp.take(params['embedding'], padded_seqs, axis=0)
    new_hidden = []
    for l in range(len(params['gru'])):
        w_ih, w_hh, b_ih, b_hh = params['gru'][l]

        def step(h, x_t):
            gx = x_t @ w_ih.T + b_ih
            gh = h @ w_hh.T + b_hh
            r = jax.nn.sigmoid(gx[:, :D] + gh[:, :D])
            z = jax.nn.sigmoid(gx[:, D:2 * D] + gh[:, D:2 * D])
            n = jnp.tanh(gx[:, 2 * D:] + r * gh[:, 2 * D:])
            h_new = (1.0 - z) * n + z * h
            return h_new, h_new

        hN, ys = jax.lax.scan(step, hidden_states[l], jnp.transpose(x, (1, 0, 2)))
        x = jnp.transpose(ys, (1, 0, 2))
        new_hidden.append(hN)
    new_hidden = jnp.stack(new_hidden, axis=0)

    dec, enc = x, encoder_padded_seqs
    scores = jnp.einsum('bqd,bkd->bqk', dec, enc) / math.sqrt(D)
    weights = jax.nn.softmax(scores, axis=-1)
    ctx = jnp.einsum('bqk,bkd->bqd', weights, enc)
    mask = (dec[:, :, 0:1] != 0.0).astype(jnp.float32)
    attn = jnp.tanh(jnp.concatenate([dec, ctx], axis=-1) @ params['w_attn'].T
                    + params['b_attn']) * mask
    logits = (attn @ params['w_out'].T + params['b_out']) * mask
    return logits, new_hidden, weights


# ---------------------------------------------------------------------------
# Deterministic parameter init (matches PyTorch module shapes).
# ---------------------------------------------------------------------------
def init_params(key, num_layers, num_dimensions, vocabulary_size):
    D, V, L = num_dimensions, vocabulary_size, num_layers
    keys = jax.random.split(key, 4 + 4 * L)
    params = {
        'embedding': 0.1 * jax.random.normal(keys[0], (V, D), jnp.float32),
        'w_attn': 0.1 * jax.random.normal(keys[1], (D, 2 * D), jnp.float32),
        'b_attn': 0.05 * jax.random.normal(keys[2], (D,), jnp.float32),
        'w_out': 0.1 * jax.random.normal(keys[3], (V, D), jnp.float32),
        'b_out': jnp.zeros((V,), jnp.float32),
        'gru': [],
    }
    for l in range(L):
        k = keys[4 + 4 * l: 8 + 4 * l]
        params['gru'].append((
            0.1 * jax.random.normal(k[0], (3 * D, D), jnp.float32),   # weight_ih_l{l}
            0.1 * jax.random.normal(k[1], (3 * D, D), jnp.float32),   # weight_hh_l{l}
            0.05 * jax.random.normal(k[2], (3 * D,), jnp.float32),    # bias_ih_l{l}
            0.05 * jax.random.normal(k[3], (3 * D,), jnp.float32),    # bias_hh_l{l}
        ))
    return params


if __name__ == "__main__":
    B, Sd, Se, D, V, L = 2, 8, 12, 32, 16, 2

    root = jax.random.PRNGKey(0)
    k_param, k_tok, k_enc, k_h0 = jax.random.split(root, 4)

    params = init_params(k_param, L, D, V)
    padded_seqs = jax.random.randint(k_tok, (B, Sd), 0, V, dtype=jnp.int32)
    seq_lengths = [Sd] * B  # unused in this scaffold's forward
    encoder_padded_seqs = jax.random.normal(k_enc, (B, Se, D), jnp.float32)
    hidden_states = 0.1 * jax.random.normal(k_h0, (L, B, D), jnp.float32)

    logits, new_hidden, attn_w = decoder_forward(
        params, padded_seqs, seq_lengths, encoder_padded_seqs, hidden_states)
    jax.block_until_ready((logits, new_hidden, attn_w))

    # Sanity-check against a pure-JAX reference.
    r_logits, r_hidden, r_w = decoder_forward_ref(
        params, padded_seqs, encoder_padded_seqs, hidden_states)
    assert logits.shape == (B, Sd, V)
    assert new_hidden.shape == (L, B, D)
    assert attn_w.shape == (B, Sd, Se)
    assert jnp.allclose(logits, r_logits, atol=2e-2, rtol=2e-2)
    assert jnp.allclose(new_hidden, r_hidden, atol=2e-2, rtol=2e-2)
    assert jnp.allclose(attn_w, r_w, atol=2e-2, rtol=2e-2)

    print("KERNEL_OK")
</pallas_src>

<mosaic_0001>
module attributes {stable_mosaic.version = 11 : i64} {
  func.func @kernel(%arg0: i32, %arg1: memref<1x8x32xf32, #tpu.memory_space<vmem>>, %arg2: memref<1x2x32xf32, #tpu.memory_space<vmem>>, %arg3: memref<1x12x32xf32, #tpu.memory_space<vmem>>, %arg4: memref<1x32x12xf32, #tpu.memory_space<vmem>>, %arg5: memref<2x32x96xf32, #tpu.memory_space<vmem>>, %arg6: memref<2x32x96xf32, #tpu.memory_space<vmem>>, %arg7: memref<2x1x96xf32, #tpu.memory_space<vmem>>, %arg8: memref<2x1x96xf32, #tpu.memory_space<vmem>>, %arg9: memref<32x32xf32, #tpu.memory_space<vmem>>, %arg10: memref<32x32xf32, #tpu.memory_space<vmem>>, %arg11: memref<1x32xf32, #tpu.memory_space<vmem>>, %arg12: memref<32x16xf32, #tpu.memory_space<vmem>>, %arg13: memref<1x16xf32, #tpu.memory_space<vmem>>, %arg14: memref<1x8x16xf32, #tpu.memory_space<vmem>>, %arg15: memref<1x2x32xf32, #tpu.memory_space<vmem>>, %arg16: memref<1x8x12xf32, #tpu.memory_space<vmem>>, %arg17: memref<8x32xf32, #tpu.memory_space<vmem>>, %arg18: memref<8x96xf32, #tpu.memory_space<vmem>>) attributes {dimension_semantics = [#tpu.dimension_semantics<parallel>], iteration_bounds = array<i64: 2>, scalar_prefetch = 0 : i64, scratch_operands = 2 : i64, tpu.core_type = #tpu.core_type<tc>, window_params = [{transform_indices = @transform_0, window_bounds = array<i64: 1, 8, 32>}, {transform_indices = @transform_1, window_bounds = array<i64: 1, 2, 32>}, {transform_indices = @transform_2, window_bounds = array<i64: 1, 12, 32>}, {transform_indices = @transform_3, window_bounds = array<i64: 1, 32, 12>}, {pipeline_mode = #tpu.pipeline_mode<synchronous>, transform_indices = @transform_4, window_bounds = array<i64: 2, 32, 96>}, {pipeline_mode = #tpu.pipeline_mode<synchronous>, transform_indices = @transform_5, window_bounds = array<i64: 2, 32, 96>}, {pipeline_mode = #tpu.pipeline_mode<synchronous>, transform_indices = @transform_6, window_bounds = array<i64: 2, 1, 96>}, {pipeline_mode = #tpu.pipeline_mode<synchronous>, transform_indices = @transform_7, window_bounds = array<i64: 2, 1, 96>}, {pipeline_mode = #tpu.pipeline_mode<synchronous>, transform_indices = @transform_8, window_bounds = array<i64: 32, 32>}, {pipeline_mode = #tpu.pipeline_mode<synchronous>, transform_indices = @transform_9, window_bounds = array<i64: 32, 32>}, {pipeline_mode = #tpu.pipeline_mode<synchronous>, transform_indices = @transform_10, window_bounds = array<i64: 1, 32>}, {pipeline_mode = #tpu.pipeline_mode<synchronous>, transform_indices = @transform_11, window_bounds = array<i64: 32, 16>}, {pipeline_mode = #tpu.pipeline_mode<synchronous>, transform_indices = @transform_12, window_bounds = array<i64: 1, 16>}, {transform_indices = @transform_13, window_bounds = array<i64: 1, 8, 16>}, {transform_indices = @transform_14, window_bounds = array<i64: 1, 2, 32>}, {transform_indices = @transform_15, window_bounds = array<i64: 1, 8, 12>}]} {
    %c0 = arith.constant 0 : index
    %c0_0 = arith.constant 0 : index
    %c0_1 = arith.constant 0 : index
    %0 = vector.load %arg2[%c0, %c0_0, %c0_1] : memref<1x2x32xf32, #tpu.memory_space<vmem>>, vector<1x2x32xf32>
    %1 = vector.shape_cast %0 : vector<1x2x32xf32> to vector<2x32xf32>
    %c0_2 = arith.constant 0 : index
    %c0_3 = arith.constant 0 : index
    %c0_4 = arith.constant 0 : index
    %2 = vector.load %arg1[%c0_2, %c0_3, %c0_4] : memref<1x8x32xf32, #tpu.memory_space<vmem>>, vector<1x8x32xf32>
    %3 = vector.shape_cast %2 : vector<1x8x32xf32> to vector<8x32xf32>
    %c0_5 = arith.constant 0 : index
    %c0_6 = arith.constant 0 : index
    %c0_7 = arith.constant 0 : index
    %4 = vector.load %arg5[%c0_5, %c0_6, %c0_7] : memref<2x32x96xf32, #tpu.memory_space<vmem>>, vector<1x32x96xf32>
    %5 = vector.shape_cast %4 : vector<1x32x96xf32> to vector<32x96xf32>
    %cst = arith.constant dense<0.000000e+00> : vector<8x96xf32>
    %6 = tpu.matmul %3, %5, %cst {dimension_numbers = #tpu.dot_dimension_numbers<[1], [0], [0], [1], [0, 0, 1, 1], [], []>} : vector<8x32xf32>, vector<32x96xf32>, vector<8x96xf32> -> vector<8x96xf32>
    %c0_8 = arith.constant 0 : index
    %c0_9 = arith.constant 0 : index
    %c0_10 = arith.constant 0 : index
    %7 = vector.load %arg7[%c0_8, %c0_9, %c0_10] : memref<2x1x96xf32, #tpu.memory_space<vmem>>, vector<1x1x96xf32>
    %8 = vector.shape_cast %7 : vector<1x1x96xf32> to vector<1x96xf32>
    %9 = vector.broadcast %8 : vector<1x96xf32> to vector<8x96xf32>
    %10 = arith.addf %6, %9 : vector<8x96xf32>
    %c0_11 = arith.constant 0 : index
    %c0_12 = arith.constant 0 : index
    %11 = vector.load %arg18[%c0_11, %c0_12] : memref<8x96xf32, #tpu.memory_space<vmem>>, vector<8x96xf32>
    tpu.vector_store %arg18[%c0_11, %c0_12], %10 {strides = array<i32>} : memref<8x96xf32, #tpu.memory_space<vmem>>, vector<8x96xf32>,
    %c0_13 = arith.constant 0 : index
    %c0_14 = arith.constant 0 : index
    %c0_15 = arith.constant 0 : index
    %12 = vector.load %arg6[%c0_13, %c0_14, %c0_15] : memref<2x32x96xf32, #tpu.memory_space<vmem>>, vector<1x32x96xf32>
    %13 = vector.shape_cast %12 : vector<1x32x96xf32> to vector<32x96xf32>
    %c0_16 = arith.constant 0 : index
    %c0_17 = arith.constant 0 : index
    %c0_18 = arith.constant 0 : index
    %14 = vector.load %arg8[%c0_16, %c0_17, %c0_18] : memref<2x1x96xf32, #tpu.memory_space<vmem>>, vector<1x1x96xf32>
    %15 = vector.shape_cast %14 : vector<1x1x96xf32> to vector<1x96xf32>
    %16 = vector.extract_strided_slice %1 {offsets = [0, 0], sizes = [1, 32], strides = [1, 1]} : vector<2x32xf32> to vector<1x32xf32>
    %c0_i32 = arith.constant 0 : i32
    %c8_i32 = arith.constant 8 : i32
    %17 = arith.addi %c0_i32, %c8_i32 : i32
    %c1_i32 = arith.constant 1 : i32
    %18 = scf.for %arg19 = %c0_i32 to %17 step %c1_i32 iter_args(%arg20 = %16) -> (vector<1x32xf32>)  : i32 {
      %85 = arith.index_cast %arg19 : i32 to index
      %c0_78 = arith.constant 0 : index
      %86 = vector.load %arg18[%85, %c0_78] : memref<8x96xf32, #tpu.memory_space<vmem>>, vector<1x96xf32>
      %cst_79 = arith.constant dense<0.000000e+00> : vector<1x96xf32>
      %87 = tpu.matmul %arg20, %13, %cst_79 {dimension_numbers = #tpu.dot_dimension_numbers<[1], [0], [0], [1], [0, 0, 1, 1], [], []>} : vector<1x32xf32>, vector<32x96xf32>, vector<1x96xf32> -> vector<1x96xf32>
      %88 = arith.addf %87, %15 : vector<1x96xf32>
      %89 = vector.extract_strided_slice %86 {offsets = [0, 0], sizes = [1, 32], strides = [1, 1]} : vector<1x96xf32> to vector<1x32xf32>
      %90 = vector.extract_strided_slice %88 {offsets = [0, 0], sizes = [1, 32], strides = [1, 1]} : vector<1x96xf32> to vector<1x32xf32>
      %91 = arith.addf %89, %90 : vector<1x32xf32>
      %92 = arith.negf %91 : vector<1x32xf32>
      %93 = math.exp %92 : vector<1x32xf32>
      %cst_80 = arith.constant 1.000000e+00 : f32
      %94 = vector.broadcast %cst_80 : f32 to vector<1x32xf32>
      %95 = arith.addf %94, %93 : vector<1x32xf32>
      %96 = arith.divf %94, %95 : vector<1x32xf32>
      %97 = vector.extract_strided_slice %86 {offsets = [0, 32], sizes = [1, 32], strides = [1, 1]} : vector<1x96xf32> to vector<1x32xf32>
      %98 = vector.extract_strided_slice %88 {offsets = [0, 32], sizes = [1, 32], strides = [1, 1]} : vector<1x96xf32> to vector<1x32xf32>
      %99 = arith.addf %97, %98 : vector<1x32xf32>
      %100 = arith.negf %99 : vector<1x32xf32>
      %101 = math.exp %100 : vector<1x32xf32>
      %cst_81 = arith.constant 1.000000e+00 : f32
      %102 = vector.broadcast %cst_81 : f32 to vector<1x32xf32>
      %103 = arith.addf %102, %101 : vector<1x32xf32>
      %104 = arith.divf %102, %103 : vector<1x32xf32>
      %105 = vector.extract_strided_slice %86 {offsets = [0, 64], sizes = [1, 32], strides = [1, 1]} : vector<1x96xf32> to vector<1x32xf32>
      %106 = vector.extract_strided_slice %88 {offsets = [0, 64], sizes = [1, 32], strides = [1, 1]} : vector<1x96xf32> to vector<1x32xf32>
      %107 = arith.mulf %96, %106 : vector<1x32xf32>
      %108 = arith.addf %105, %107 : vector<1x32xf32>
      %109 = math.tanh %108 : vector<1x32xf32>
      %cst_82 = arith.constant 1.000000e+00 : f32
      %110 = vector.broadcast %cst_82 : f32 to vector<1x32xf32>
      %111 = arith.subf %110, %104 : vector<1x32xf32>
      %112 = arith.mulf %111, %109 : vector<1x32xf32>
      %113 = arith.mulf %104, %arg20 : vector<1x32xf32>
      %114 = arith.addf %112, %113 : vector<1x32xf32>
      %115 = arith.index_cast %arg19 : i32 to index
      %c0_83 = arith.constant 0 : index
      %116 = vector.load %arg17[%115, %c0_83] : memref<8x32xf32, #tpu.memory_space<vmem>>, vector<1x32xf32>
      tpu.vector_store %arg17[%115, %c0_83], %114 {strides = array<i32>} : memref<8x32xf32, #tpu.memory_space<vmem>>, vector<1x32xf32>,
      scf.yield %114 : vector<1x32xf32>
    }
    %c8_i32_19 = arith.constant 8 : i32
    %c0_20 = arith.constant 0 : index
    %c0_21 = arith.constant 0 : index
    %19 = vector.load %arg17[%c0_20, %c0_21] : memref<8x32xf32, #tpu.memory_space<vmem>>, vector<8x32xf32>
    %c1 = arith.constant 1 : index
    %c0_22 = arith.constant 0 : index
    %c0_23 = arith.constant 0 : index
    %20 = vector.load %arg5[%c1, %c0_22, %c0_23] : memref<2x32x96xf32, #tpu.memory_space<vmem>>, vector<1x32x96xf32>
    %21 = vector.shape_cast %20 : vector<1x32x96xf32> to vector<32x96xf32>
    %cst_24 = arith.constant dense<0.000000e+00> : vector<8x96xf32>
    %22 = tpu.matmul %19, %21, %cst_24 {dimension_numbers = #tpu.dot_dimension_numbers<[1], [0], [0], [1], [0, 0, 1, 1], [], []>} : vector<8x32xf32>, vector<32x96xf32>, vector<8x96xf32> -> vector<8x96xf32>
    %c1_25 = arith.constant 1 : index
    %c0_26 = arith.constant 0 : index
    %c0_27 = arith.constant 0 : index
    %23 = vector.load %arg7[%c1_25, %c0_26, %c0_27] : memref<2x1x96xf32, #tpu.memory_space<vmem>>, vector<1x1x96xf32>
    %24 = vector.shape_cast %23 : vector<1x1x96xf32> to vector<1x96xf32>
    %25 = vector.broadcast %24 : vector<1x96xf32> to vector<8x96xf32>
    %26 = arith.addf %22, %25 : vector<8x96xf32>
    %c0_28 = arith.constant 0 : index
    %c0_29 = arith.constant 0 : index
    %27 = vector.load %arg18[%c0_28, %c0_29] : memref<8x96xf32, #tpu.memory_space<vmem>>, vector<8x96xf32>
    tpu.vector_store %arg18[%c0_28, %c0_29], %26 {strides = array<i32>} : memref<8x96xf32, #tpu.memory_space<vmem>>, vector<8x96xf32>,
    %c1_30 = arith.constant 1 : index
    %c0_31 = arith.constant 0 : index
    %c0_32 = arith.constant 0 : index
    %28 = vector.load %arg6[%c1_30, %c0_31, %c0_32] : memref<2x32x96xf32, #tpu.memory_space<vmem>>, vector<1x32x96xf32>
    %29 = vector.shape_cast %28 : vector<1x32x96xf32> to vector<32x96xf32>
    %c1_33 = arith.constant 1 : index
    %c0_34 = arith.constant 0 : index
    %c0_35 = arith.constant 0 : index
    %30 = vector.load %arg8[%c1_33, %c0_34, %c0_35] : memref<2x1x96xf32, #tpu.memory_space<vmem>>, vector<1x1x96xf32>
    %31 = vector.shape_cast %30 : vector<1x1x96xf32> to vector<1x96xf32>
    %32 = vector.extract_strided_slice %1 {offsets = [1, 0], sizes = [1, 32], strides = [1, 1]} : vector<2x32xf32> to vector<1x32xf32>
    %c0_i32_36 = arith.constant 0 : i32
    %c8_i32_37 = arith.constant 8 : i32
    %33 = arith.addi %c0_i32_36, %c8_i32_37 : i32
    %c1_i32_38 = arith.constant 1 : i32
    %34 = scf.for %arg19 = %c0_i32_36 to %33 step %c1_i32_38 iter_args(%arg20 = %32) -> (vector<1x32xf32>)  : i32 {
      %85 = arith.index_cast %arg19 : i32 to index
      %c0_78 = arith.constant 0 : index
      %86 = vector.load %arg18[%85, %c0_78] : memref<8x96xf32, #tpu.memory_space<vmem>>, vector<1x96xf32>
      %cst_79 = arith.constant dense<0.000000e+00> : vector<1x96xf32>
      %87 = tpu.matmul %arg20, %29, %cst_79 {dimension_numbers = #tpu.dot_dimension_numbers<[1], [0], [0], [1], [0, 0, 1, 1], [], []>} : vector<1x32xf32>, vector<32x96xf32>, vector<1x96xf32> -> vector<1x96xf32>
      %88 = arith.addf %87, %31 : vector<1x96xf32>
      %89 = vector.extract_strided_slice %86 {offsets = [0, 0], sizes = [1, 32], strides = [1, 1]} : vector<1x96xf32> to vector<1x32xf32>
      %90 = vector.extract_strided_slice %88 {offsets = [0, 0], sizes = [1, 32], strides = [1, 1]} : vector<1x96xf32> to vector<1x32xf32>
      %91 = arith.addf %89, %90 : vector<1x32xf32>
      %92 = arith.negf %91 : vector<1x32xf32>
      %93 = math.exp %92 : vector<1x32xf32>
      %cst_80 = arith.constant 1.000000e+00 : f32
      %94 = vector.broadcast %cst_80 : f32 to vector<1x32xf32>
      %95 = arith.addf %94, %93 : vector<1x32xf32>
      %96 = arith.divf %94, %95 : vector<1x32xf32>
      %97 = vector.extract_strided_slice %86 {offsets = [0, 32], sizes = [1, 32], strides = [1, 1]} : vector<1x96xf32> to vector<1x32xf32>
      %98 = vector.extract_strided_slice %88 {offsets = [0, 32], sizes = [1, 32], strides = [1, 1]} : vector<1x96xf32> to vector<1x32xf32>
      %99 = arith.addf %97, %98 : vector<1x32xf32>
      %100 = arith.negf %99 : vector<1x32xf32>
      %101 = math.exp %100 : vector<1x32xf32>
      %cst_81 = arith.constant 1.000000e+00 : f32
      %102 = vector.broadcast %cst_81 : f32 to vector<1x32xf32>
      %103 = arith.addf %102, %101 : vector<1x32xf32>
      %104 = arith.divf %102, %103 : vector<1x32xf32>
      %105 = vector.extract_strided_slice %86 {offsets = [0, 64], sizes = [1, 32], strides = [1, 1]} : vector<1x96xf32> to vector<1x32xf32>
      %106 = vector.extract_strided_slice %88 {offsets = [0, 64], sizes = [1, 32], strides = [1, 1]} : vector<1x96xf32> to vector<1x32xf32>
      %107 = arith.mulf %96, %106 : vector<1x32xf32>
      %108 = arith.addf %105, %107 : vector<1x32xf32>
      %109 = math.tanh %108 : vector<1x32xf32>
      %cst_82 = arith.constant 1.000000e+00 : f32
      %110 = vector.broadcast %cst_82 : f32 to vector<1x32xf32>
      %111 = arith.subf %110, %104 : vector<1x32xf32>
      %112 = arith.mulf %111, %109 : vector<1x32xf32>
      %113 = arith.mulf %104, %arg20 : vector<1x32xf32>
      %114 = arith.addf %112, %113 : vector<1x32xf32>
      %115 = arith.index_cast %arg19 : i32 to index
      %c0_83 = arith.constant 0 : index
      %116 = vector.load %arg17[%115, %c0_83] : memref<8x32xf32, #tpu.memory_space<vmem>>, vector<1x32xf32>
      tpu.vector_store %arg17[%115, %c0_83], %114 {strides = array<i32>} : memref<8x32xf32, #tpu.memory_space<vmem>>, vector<1x32xf32>,
      scf.yield %114 : vector<1x32xf32>
    }
    %c8_i32_39 = arith.constant 8 : i32
    %35 = tpu.concatenate %18, %34 in 0 : vector<1x32xf32>, vector<1x32xf32> -> vector<2x32xf32>
    %36 = vector.shape_cast %35 : vector<2x32xf32> to vector<1x2x32xf32>
    %c0_40 = arith.constant 0 : index
    %c0_41 = arith.constant 0 : index
    %c0_42 = arith.constant 0 : index
    %37 = vector.load %arg15[%c0_40, %c0_41, %c0_42] : memref<1x2x32xf32, #tpu.memory_space<vmem>>, vector<1x2x32xf32>
    tpu.vector_store %arg15[%c0_40, %c0_41, %c0_42], %36 {strides = array<i32>} : memref<1x2x32xf32, #tpu.memory_space<vmem>>, vector<1x2x32xf32>,
    %c0_43 = arith.constant 0 : index
    %c0_44 = arith.constant 0 : index
    %38 = vector.load %arg17[%c0_43, %c0_44] : memref<8x32xf32, #tpu.memory_space<vmem>>, vector<8x32xf32>
    %c0_45 = arith.constant 0 : index
    %c0_46 = arith.constant 0 : index
    %c0_47 = arith.constant 0 : index
    %39 = vector.load %arg3[%c0_45, %c0_46, %c0_47] : memref<1x12x32xf32, #tpu.memory_space<vmem>>, vector<1x12x32xf32>
    %40 = vector.shape_cast %39 : vector<1x12x32xf32> to vector<12x32xf32>
    %c0_48 = arith.constant 0 : index
    %c0_49 = arith.constant 0 : index
    %c0_50 = arith.constant 0 : index
    %41 = vector.load %arg4[%c0_48, %c0_49, %c0_50] : memref<1x32x12xf32, #tpu.memory_space<vmem>>, vector<1x32x12xf32>
    %42 = vector.shape_cast %41 : vector<1x32x12xf32> to vector<32x12xf32>
    %cst_51 = arith.constant dense<0.000000e+00> : vector<8x12xf32>
    %43 = tpu.matmul %38, %42, %cst_51 {dimension_numbers = #tpu.dot_dimension_numbers<[1], [0], [0], [1], [0, 0, 1, 1], [], []>} : vector<8x32xf32>, vector<32x12xf32>, vector<8x12xf32> -> vector<8x12xf32>
    %cst_52 = arith.constant 0.176776692 : f32
    %44 = vector.broadcast %cst_52 : f32 to vector<8x12xf32>
    %45 = arith.mulf %43, %44 : vector<8x12xf32>
    %cst_53 = arith.constant dense<0xFF800000> : vector<8xf32>
    %46 = vector.multi_reduction <maximumf>, %45, %cst_53 [1] : vector<8x12xf32> to vector<8xf32>
    %47 = vector.shape_cast %46 : vector<8xf32> to vector<8x1xf32>
    %48 = vector.broadcast %47 : vector<8x1xf32> to vector<8x12xf32>
    %49 = arith.subf %45, %48 : vector<8x12xf32>
    %50 = math.exp %49 : vector<8x12xf32>
    %cst_54 = arith.constant dense<0.000000e+00> : vector<8xf32>
    %51 = vector.multi_reduction <add>, %50, %cst_54 [1] : vector<8x12xf32> to vector<8xf32>
    %52 = vector.shape_cast %51 : vector<8xf32> to vector<8x1xf32>
    %53 = tpu.reciprocal %52 {approx = true} : vector<8x1xf32> -> vector<8x1xf32>
    %54 = vector.broadcast %53 : vector<8x1xf32> to vector<8x12xf32>
    %55 = arith.mulf %50, %54 : vector<8x12xf32>
    %cst_55 = arith.constant dense<0.000000e+00> : vector<8x32xf32>
    %56 = tpu.matmul %55, %40, %cst_55 {dimension_numbers = #tpu.dot_dimension_numbers<[1], [0], [0], [1], [0, 0, 1, 1], [], []>} : vector<8x12xf32>, vector<12x32xf32>, vector<8x32xf32> -> vector<8x32xf32>
    %57 = vector.extract_strided_slice %38 {offsets = [0, 0], sizes = [8, 1], strides = [1, 1]} : vector<8x32xf32> to vector<8x1xf32>
    %cst_56 = arith.constant 0.000000e+00 : f32
    %58 = vector.broadcast %cst_56 : f32 to vector<8x1xf32>
    %59 = arith.cmpf one, %57, %58 : vector<8x1xf32>
    %cst_57 = arith.constant 1.000000e+00 : f32
    %cst_58 = arith.constant 0.000000e+00 : f32
    %60 = vector.broadcast %cst_57 : f32 to vector<8x1xf32>
    %61 = vector.broadcast %cst_58 : f32 to vector<8x1xf32>
    %62 = arith.select %59, %60, %61 : vector<8x1xi1>, vector<8x1xf32>
    %c0_59 = arith.constant 0 : index
    %c0_60 = arith.constant 0 : index
    %63 = vector.load %arg9[%c0_59, %c0_60] : memref<32x32xf32, #tpu.memory_space<vmem>>, vector<32x32xf32>
    %cst_61 = arith.constant dense<0.000000e+00> : vector<8x32xf32>
    %64 = tpu.matmul %38, %63, %cst_61 {dimension_numbers = #tpu.dot_dimension_numbers<[1], [0], [0], [1], [0, 0, 1, 1], [], []>} : vector<8x32xf32>, vector<32x32xf32>, vector<8x32xf32> -> vector<8x32xf32>
    %c0_62 = arith.constant 0 : index
    %c0_63 = arith.constant 0 : index
    %65 = vector.load %arg10[%c0_62, %c0_63] : memref<32x32xf32, #tpu.memory_space<vmem>>, vector<32x32xf32>
    %cst_64 = arith.constant dense<0.000000e+00> : vector<8x32xf32>
    %66 = tpu.matmul %56, %65, %cst_64 {dimension_numbers = #tpu.dot_dimension_numbers<[1], [0], [0], [1], [0, 0, 1, 1], [], []>} : vector<8x32xf32>, vector<32x32xf32>, vector<8x32xf32> -> vector<8x32xf32>
    %67 = arith.addf %64, %66 : vector<8x32xf32>
    %c0_65 = arith.constant 0 : index
    %c0_66 = arith.constant 0 : index
    %68 = vector.load %arg11[%c0_65, %c0_66] : memref<1x32xf32, #tpu.memory_space<vmem>>, vector<1x32xf32>
    %69 = vector.broadcast %68 : vector<1x32xf32> to vector<8x32xf32>
    %70 = arith.addf %67, %69 : vector<8x32xf32>
    %71 = math.tanh %70 : vector<8x32xf32>
    %72 = vector.broadcast %62 : vector<8x1xf32> to vector<8x32xf32>
    %73 = arith.mulf %71, %72 : vector<8x32xf32>
    %c0_67 = arith.constant 0 : index
    %c0_68 = arith.constant 0 : index
    %74 = vector.load %arg12[%c0_67, %c0_68] : memref<32x16xf32, #tpu.memory_space<vmem>>, vector<32x16xf32>
    %cst_69 = arith.constant dense<0.000000e+00> : vector<8x16xf32>
    %75 = tpu.matmul %73, %74, %cst_69 {dimension_numbers = #tpu.dot_dimension_numbers<[1], [0], [0], [1], [0, 0, 1, 1], [], []>} : vector<8x32xf32>, vector<32x16xf32>, vector<8x16xf32> -> vector<8x16xf32>
    %c0_70 = arith.constant 0 : index
    %c0_71 = arith.constant 0 : index
    %76 = vector.load %arg13[%c0_70, %c0_71] : memref<1x16xf32, #tpu.memory_space<vmem>>, vector<1x16xf32>
    %77 = vector.broadcast %76 : vector<1x16xf32> to vector<8x16xf32>
    %78 = arith.addf %75, %77 : vector<8x16xf32>
    %79 = vector.broadcast %62 : vector<8x1xf32> to vector<8x16xf32>
    %80 = arith.mulf %78, %79 : vector<8x16xf32>
    %81 = vector.shape_cast %80 : vector<8x16xf32> to vector<1x8x16xf32>
    %c0_72 = arith.constant 0 : index
    %c0_73 = arith.constant 0 : index
    %c0_74 = arith.constant 0 : index
    %82 = vector.load %arg14[%c0_72, %c0_73, %c0_74] : memref<1x8x16xf32, #tpu.memory_space<vmem>>, vector<1x8x16xf32>
    tpu.vector_store %arg14[%c0_72, %c0_73, %c0_74], %81 {strides = array<i32>} : memref<1x8x16xf32, #tpu.memory_space<vmem>>, vector<1x8x16xf32>,
    %83 = vector.shape_cast %55 : vector<8x12xf32> to vector<1x8x12xf32>
    %c0_75 = arith.constant 0 : index
    %c0_76 = arith.constant 0 : index
    %c0_77 = arith.constant 0 : index
    %84 = vector.load %arg16[%c0_75, %c0_76, %c0_77] : memref<1x8x12xf32, #tpu.memory_space<vmem>>, vector<1x8x12xf32>
    tpu.vector_store %arg16[%c0_75, %c0_76, %c0_77], %83 {strides = array<i32>} : memref<1x8x12xf32, #tpu.memory_space<vmem>>, vector<1x8x12xf32>,
    return
  }
  func.func @transform_0(%arg0: i32) -> (i32, i32, i32) {
    %c0_i32 = arith.constant 0 : i32
    %c0_i32_0 = arith.constant 0 : i32
    %c0_i32_1 = arith.constant 0 : i32
    return %arg0, %c0_i32, %c0_i32_0 : i32, i32, i32
  }
  func.func @transform_1(%arg0: i32) -> (i32, i32, i32) {
    %c0_i32 = arith.constant 0 : i32
    %c0_i32_0 = arith.constant 0 : i32
    %c0_i32_1 = arith.constant 0 : i32
    return %arg0, %c0_i32, %c0_i32_0 : i32, i32, i32
  }
  func.func @transform_2(%arg0: i32) -> (i32, i32, i32) {
    %c0_i32 = arith.constant 0 : i32
    %c0_i32_0 = arith.constant 0 : i32
    %c0_i32_1 = arith.constant 0 : i32
    return %arg0, %c0_i32, %c0_i32_0 : i32, i32, i32
  }
  func.func @transform_3(%arg0: i32) -> (i32, i32, i32) {
    %c0_i32 = arith.constant 0 : i32
    %c0_i32_0 = arith.constant 0 : i32
    %c0_i32_1 = arith.constant 0 : i32
    return %arg0, %c0_i32, %c0_i32_0 : i32, i32, i32
  }
  func.func @transform_4(%arg0: i32) -> (i32, i32, i32) {
    %c0_i32 = arith.constant 0 : i32
    %c0_i32_0 = arith.constant 0 : i32
    %c0_i32_1 = arith.constant 0 : i32
    %c0_i32_2 = arith.constant 0 : i32
    return %c0_i32, %c0_i32_0, %c0_i32_1 : i32, i32, i32
  }
  func.func @transform_5(%arg0: i32) -> (i32, i32, i32) {
    %c0_i32 = arith.constant 0 : i32
    %c0_i32_0 = arith.constant 0 : i32
    %c0_i32_1 = arith.constant 0 : i32
    %c0_i32_2 = arith.constant 0 : i32
    return %c0_i32, %c0_i32_0, %c0_i32_1 : i32, i32, i32
  }
  func.func @transform_6(%arg0: i32) -> (i32, i32, i32) {
    %c0_i32 = arith.constant 0 : i32
    %c0_i32_0 = arith.constant 0 : i32
    %c0_i32_1 = arith.constant 0 : i32
    %c0_i32_2 = arith.constant 0 : i32
    return %c0_i32, %c0_i32_0, %c0_i32_1 : i32, i32, i32
  }
  func.func @transform_7(%arg0: i32) -> (i32, i32, i32) {
    %c0_i32 = arith.constant 0 : i32
    %c0_i32_0 = arith.constant 0 : i32
    %c0_i32_1 = arith.constant 0 : i32
    %c0_i32_2 = arith.constant 0 : i32
    return %c0_i32, %c0_i32_0, %c0_i32_1 : i32, i32, i32
  }
  func.func @transform_8(%arg0: i32) -> (i32, i32) {
    %c0_i32 = arith.constant 0 : i32
    %c0_i32_0 = arith.constant 0 : i32
    %c0_i32_1 = arith.constant 0 : i32
    return %c0_i32, %c0_i32_0 : i32, i32
  }
  func.func @transform_9(%arg0: i32) -> (i32, i32) {
    %c0_i32 = arith.constant 0 : i32
    %c0_i32_0 = arith.constant 0 : i32
    %c0_i32_1 = arith.constant 0 : i32
    return %c0_i32, %c0_i32_0 : i32, i32
  }
  func.func @transform_10(%arg0: i32) -> (i32, i32) {
    %c0_i32 = arith.constant 0 : i32
    %c0_i32_0 = arith.constant 0 : i32
    %c0_i32_1 = arith.constant 0 : i32
    return %c0_i32, %c0_i32_0 : i32, i32
  }
  func.func @transform_11(%arg0: i32) -> (i32, i32) {
    %c0_i32 = arith.constant 0 : i32
    %c0_i32_0 = arith.constant 0 : i32
    %c0_i32_1 = arith.constant 0 : i32
    return %c0_i32, %c0_i32_0 : i32, i32
  }
  func.func @transform_12(%arg0: i32) -> (i32, i32) {
    %c0_i32 = arith.constant 0 : i32
    %c0_i32_0 = arith.constant 0 : i32
    %c0_i32_1 = arith.constant 0 : i32
    return %c0_i32, %c0_i32_0 : i32, i32
  }
  func.func @transform_13(%arg0: i32) -> (i32, i32, i32) {
    %c0_i32 = arith.constant 0 : i32
    %c0_i32_0 = arith.constant 0 : i32
    %c0_i32_1 = arith.constant 0 : i32
    return %arg0, %c0_i32, %c0_i32_0 : i32, i32, i32
  }
  func.func @transform_14(%arg0: i32) -> (i32, i32, i32) {
    %c0_i32 = arith.constant 0 : i32
    %c0_i32_0 = arith.constant 0 : i32
    %c0_i32_1 = arith.constant 0 : i32
    return %arg0, %c0_i32, %c0_i32_0 : i32, i32, i32
  }
  func.func @transform_15(%arg0: i32) -> (i32, i32, i32) {
    %c0_i32 = arith.constant 0 : i32
    %c0_i32_0 = arith.constant 0 : i32
    %c0_i32_1 = arith.constant 0 : i32
    return %arg0, %c0_i32, %c0_i32_0 : i32, i32, i32
  }
}

</mosaic_0001>

<bundles_post_ra>
// kernel: tpu_custom_call.1
= control target key start
LH: loop header
LB: loop body
LE: loop exit
PB: predicated region body
PF: predicated region fallthrough
CT: control target
= control target key end

     0   :  { %s2936_s0 = inlined_call_operand.hbm [shape: f32[2,8,32], index: 0, kind: input, shape index: {}]   ;;  %s2937_s1 = inlined_call_operand.hbm [shape: f32[2,2,32], index: 1, kind: input, shape index: {}]   ;;  %s2938_s2 = inlined_call_operand.vmem [shape: f32[2,12,32], index: 2, kind: input, shape index: {}]   ;;  %s2939_s3 = inlined_call_operand.vmem [shape: f32[2,32,12], index: 3, kind: input, shape index: {}]   ;;  %s2940_s4 = inlined_call_operand.vmem [shape: f32[2,32,96], index: 4, kind: input, shape index: {}]   ;;  %s2941_s5 = inlined_call_operand.vmem [shape: f32[2,32,96], index: 5, kind: input, shape index: {}]   ;;  %s2942_s6 = inlined_call_operand.vmem [shape: f32[2,1,96], index: 6, kind: input, shape index: {}]   ;;  %s2943_s7 = inlined_call_operand.vmem [shape: f32[2,1,96], index: 7, kind: input, shape index: {}]   ;;  %s2944_s8 = inlined_call_operand.vmem [shape: f32[32,32], index: 8, kind: input, shape index: {}]   ;;  %s2945_s9 = inlined_call_operand.vmem [shape: f32[32,32], index: 9, kind: input, shape index: {}]   ;;  %s2946_s10 = inlined_call_operand.vmem [shape: f32[1,32], index: 10, kind: input, shape index: {}]   ;;  %s2947_s11 = inlined_call_operand.vmem [shape: f32[32,16], index: 11, kind: input, shape index: {}]   ;;  %s2948_s12 = inlined_call_operand.vmem [shape: f32[1,16], index: 12, kind: input, shape index: {}]   ;;  %s2949_s13 = inlined_call_operand.hbm [shape: f32[2,8,16], index: 13, kind: output, shape index: {0}]   ;;  %s2950_s14 = inlined_call_operand.hbm [shape: f32[2,2,32], index: 14, kind: output, shape index: {1}]   ;;  %s2951_s15 = inlined_call_operand.hbm [shape: f32[2,8,12], index: 15, kind: output, shape index: {2}]  }
   0x1   :  { %2964 = sst [smem:[#allocation23_spill]] %s2936_s0 }
   0x2   :  { %2965 = sst [smem:[#allocation24_spill]] %s2948_s12 }
   0x3   :  { %2966 = sst [smem:[#allocation25_spill]] %s2949_s13 }
   0x4   :  { %21 = vsyncpa [#allocation5], 0 }
   0x5   :  { %23 = vsyncpa [#allocation5 + $0x1], 0 }
   0x6   :  { %24 = vsyncpa [#allocation8], 0 }
   0x7   :  { %26 = vsyncpa [#allocation8 + $0x1], 0 }
   0x8   :  { %27 = vsyncpa [#allocation6], 0 }
   0x9   :  { %29 = vsyncpa [#allocation6 + $0x1], 0 }
   0xa   :  { %30 = vsyncpa [#allocation11], 0 }
   0xb   :  { %32 = vsyncpa [#allocation11 + $0x1], 0  ;;  %s2413_s18 = smov 0   ;;  %s2415_s19 = smov 0  }
   0xc   :  { %s2417_s20 = smov 0   ;;  %s2419_s21 = smov 0  }
   0xd LB: > { %2967 = sst [smem:[#allocation17_spill]] %s2281_s18  ;;  %s2434_s22 = sadd.s32 4294967295, %s2293_s21   ;;  %s2293_s21 = sphi %s2419_s21, %s2999_s21   ;;  %s2289_s20 = sphi %s2417_s20, %s3001_s20   ;;  %s2285_s19 = sphi %s2415_s19, %s3003_s19   ;;  %s2281_s18 = sphi %s2413_s18, %s3002_s18  }
   0xe   : > { %2968 = sst [smem:[#allocation18_spill]] %s2289_s20  ;;  %s2954_s23 = sadd.s32 4294967294, %s2293_s21  }
   0xf   : > { %2969 = sst [smem:[#allocation19_spill]] %s2293_s21  ;;  %s2438_s24 = sadd.s32 1, %s2293_s21  }
  0x10   : > { %2970 = sst [smem:[#allocation20_spill]] %s2438_s24  ;;  %s45_s25 = sadd.s32 1, %s2289_s20 }
  0x11   : > { %s42_s26 = ssub.s32 %s2293_s21, %s2438_s24  ;;  %p52_p0 = scmp.ne.s32.totalorder %s2289_s20, %s2285_s19 }
  0x12   : > { %p43_p1 = scmp.eq.s32.totalorder %s42_s26, 0  ;;  %p53_p2 = scmp.eq.s32.totalorder %s2293_s21, 0 }
  0x13   : > { %p58_p3 = scmp.ne.s32.totalorder %s2285_s19, %s2281_s18  ;;  %p59_p4 = scmp.eq.s32.totalorder %s2434_s22, 0 }
  0x14   : > { %s2450_s27 = scalar_select %p43_p1, %s2289_s20, %s45_s25  }
  0x15   : > { %p2452_p5 = por %p53_p2, %p52_p0  ;;  %p2456_p6 = por %p59_p4, %p58_p3 }
  0x16   : > { %2971 = sst [smem:[#allocation21_spill]] %s2450_s27  ;;  %p349_p7 = scmp.eq.s32.totalorder %s2434_s22, 1 }
  0x17   : > { %s2973_s29 = scalar_select %p2456_p6, 1, 0 }
  0x18   : > { %p355_p8 = scmp.eq.s32.totalorder %s2954_s23, 1  ;;  %p1984_p10 = scmp.lt.s32.totalorder %s2293_s21, 2 }
  0x19   : > { %p2465_p11 = por %p349_p7, %p52_p0  ;;  %s2474_s17 = sand.u32 1, %s2289_s20  }
  0x1a   : > { %p2469_p12 = por %p355_p8, %p58_p3  ;;  %s1718_s25 = sshll.u32 %s2293_s21, 7 }
  0x1b   : > { %s2974_s30 = scalar_select %p2465_p11, 1, 0 }
  0x1c   : > { %s2975_s16 = scalar_select %p2469_p12, 1, 0 }
  0x1d   : > { %s1717_s26 = sshll.u32 %s2474_s17, 3  ;;  %s2977_s0 = sld [smem:[#allocation23_spill]] }
  0x1e   : > { %2976 = sst [smem:[#allocation22_spill]] %s2975_s16  ;;  %s458_s18 = scalar_lea.vmem [#allocation4], %s1717_s26 }
  0x1f   : > { %s465_s13 = sshll.u32 %s458_s18, 4  ;;  %p2485_p13 = pnand %p1984_p10, %p2452_p5  ;;  %s2489_s13 = int_to_ptr.vmem [resolvable:$true] %s465_s13 }
  0x20   : > { %s455_s24 = scalar_lea.sflag [#allocation5], %s2474_s17 }
  0x21   : > { %p2089_p3 = pneg %p2485_p13 }
  0x23   : > { %s2481_s23 = scalar_lea.hbm %s2977_s0, %s1718_s25  ;;  %s2092_s25 = scalar_lea.hbm %s2977_s0, 256 }
  0x24   : > { %s2087_s27 = scalar_lea.hbm %s2481_s23, 128  ;;  %p2093_p5 = scmp.lt.u32.totalorder %s2481_s23, %s2977_s0 }
  0x25   : > { %p2088_p2 = scmp.ne.s32.totalorder %s2481_s23, %s2087_s27  ;;  %p2094_p8 = scmp.lt.u32.totalorder %s2092_s25, %s2087_s27 }
  0x26   : > { %p2096_p9 = scmp.lt.u32.totalorder %s2087_s27, %s2481_s23 }
  0x27   : > { %p2090_p4 = pnand %p2089_p3, %p2088_p2  ;;  %p2095_p10 = por %p2094_p8, %p2093_p5 }
  0x29   : > { %p2091_p7 = pneg %p2090_p4  ;;  %p2097_p0 = por %p2096_p9, %p2095_p10 }
  0x2b   : > { %p2098_p1 = pnand %p2097_p0, %p2091_p7 }
  0x2d   : > { %2101 = shalt.err (!%p2098_p1)
}
  0x2e   : > { %s2102_s12 = scalar_lea.vmem %s2489_s13, 128  ;;  %s2311_s18 = smov [#allocation4]  }
  0x2f   : > { %p2103_p2 = scmp.ne.s32.totalorder %s2489_s13, %s2102_s12  ;;  %s2107_s28 = sshll.u32 %s2311_s18, 4  ;;  %s2108_s28 = int_to_ptr.vmem [resolvable:$false] %s2107_s28 }
  0x30   : > { %s2109_s20 = scalar_lea.vmem %s2108_s28, 256  ;;  %p2110_p11 = scmp.lt.s32.totalorder %s2489_s13, %s2108_s28 }
  0x31   : > { %p2105_p4 = pnand %p2103_p2, %p2089_p3  ;;  %p2111_p5 = scmp.lt.s32.totalorder %s2109_s20, %s2102_s12 }
  0x33   : > { %p2106_p12 = pneg %p2105_p4  ;;  %p2112_p8 = por %p2111_p5, %p2110_p11 }
  0x35   : > { %p2113_p9 = pnand %p2112_p8, %p2106_p12 }
  0x37   : > { %2116 = shalt.err (!%p2113_p9)
}
  0x38   : > { %1970 = dma.hbm_to_vmem [thread:$0]  (!%p2485_p13), %s2481_s23, 128, %s2489_s13, %s455_s24  }
  0x39   : > { %p2979_p0 = scmp.lt.s32.totalorder %s2293_s21, 3  ;;  %p2980_p1 = scmp.ge.s32.totalorder %s2293_s21, 1 }
  0x3a   : > { %s1719_s12 = sshll.u32 %s2474_s17, 1  ;;  %s1720_s25 = sshll.u32 %s2293_s21, 5 }
  0x3b   : > { %p2523_p7 = pnand %p2980_p1, %p2979_p0  ;;  %s2532_s28 = scalar_lea.hbm %s2937_s1, %s1720_s25 }
  0x3c   : > { %s476_s20 = scalar_lea.vmem [#allocation7], %s1719_s12  ;;  %s473_s13 = scalar_lea.sflag [#allocation8], %s2474_s17 }
  0x3d   : > { %s2981_s27 = scalar_select %p2523_p7, 1, 0 }
  0x3e   : > { %s483_s0 = sshll.u32 %s476_s20, 4  ;;  %s2117_s23 = scalar_lea.hbm %s2532_s28, 32  ;;  %s484_s0 = int_to_ptr.vmem [resolvable:$true] %s483_s0 }
  0x3f   : > { %p2118_p11 = scmp.ne.s32.totalorder %s2532_s28, %s2117_s23  ;;  %s2122_s26 = scalar_lea.hbm %s2937_s1, 64 }
  0x40   : > { %p2123_p2 = scmp.lt.u32.totalorder %s2532_s28, %s2937_s1  ;;  %p2124_p4 = scmp.lt.u32.totalorder %s2122_s26, %s2117_s23 }
  0x41   : > { %p2120_p12 = pnand %p2118_p11, %p2089_p3  ;;  %p2126_p8 = scmp.lt.u32.totalorder %s2117_s23, %s2532_s28 }
  0x42   : > { %p2125_p5 = por %p2124_p4, %p2123_p2 }
  0x43   : > { %p2121_p10 = pneg %p2120_p12 }
  0x44   : > { %p2127_p9 = por %p2126_p8, %p2125_p5 }
  0x46   : > { %p2128_p0 = pnand %p2127_p9, %p2121_p10 }
  0x48   : > { %2131 = shalt.err (!%p2128_p0)
}
  0x49   : > { %s2132_s17 = scalar_lea.vmem %s484_s0, 32  ;;  %s2312_s12 = smov [#allocation7]  }
  0x4a   : > { %p2133_p1 = scmp.ne.s32.totalorder %s484_s0, %s2132_s17  ;;  %s2137_s21 = sshll.u32 %s2312_s12, 4  ;;  %s2138_s21 = int_to_ptr.vmem [resolvable:$false] %s2137_s21 }
  0x4b   : > { %s2139_s20 = scalar_lea.vmem %s2138_s21, 64  ;;  %p2140_p6 = scmp.lt.s32.totalorder %s484_s0, %s2138_s21 }
  0x4c   : > { %p2135_p11 = pnand %p2133_p1, %p2089_p3  ;;  %p2141_p7 = scmp.lt.s32.totalorder %s2139_s20, %s2132_s17 }
  0x4e   : > { %p2136_p12 = pneg %p2135_p11  ;;  %p2142_p2 = por %p2141_p7, %p2140_p6 }
  0x50   : > { %p2143_p4 = pnand %p2142_p2, %p2136_p12 }
  0x52   : > { %2146 = shalt.err (!%p2143_p4)
}
  0x53   : > { %1973 = dma.hbm_to_vmem [thread:$0]  (!%p2485_p13), %s2532_s28, 32, %s484_s0, %s473_s13  }
  0x54   : > { %p2982_p10 = scmp.ne.s32.totalorder %s2981_s27, 0 }
  0x55   : > { %s2557_s23 = sand.u32 (!%p2982_p10), 1, %s2285_s19   ;;  %p2983_p6 = scmp.ne.s32.totalorder (!%p2982_p10), %s2973_s29, 0 }
  0x56   : > { %508 = sbr.rel (%p2982_p10) target bundleno = 3169 (0xc61), region = 72  ;;  %s2560_s24 = sshll.u32 (!%p2982_p10), %s2557_s23, 3 }
  0x57   : > { %s511_s26 = scalar_lea.sflag (!%p2982_p10), [#allocation5], %s2557_s23 }
  0x5d   : > { %2264 = dma.done.wait (%p2983_p6), %s511_s26, 128  }
  0x5e   : > { %2266 = vsyncadd (%p2983_p6), %s511_s26, 4294967168  ;;  %s2963_s0 = sshll.u32 %s2557_s23, 1  ;;  %s520_s16 = scalar_lea.sflag [#allocation8], %s2557_s23 }
  0x5f   : > { %s523_s27 = scalar_lea.vmem [#allocation7], %s2963_s0 }
  0x60   : > { %2268 = dma.done.wait (%p2983_p6), %s520_s16, 32  }
  0x61   : > { %2270 = vsyncadd (%p2983_p6), %s520_s16, 4294967264  ;;  %p595_p13 = scmp.lt.s32.totalorder %s2434_s22, 1  ;;  %v2313_v0 = vmov 0.0|0.0   ;;  %vm2314_vm0 = vmmov 0   ;;  %v2315_v1 = vmov 0.0   ;;  %v2596_v3 = vld [vmem:[%s2941_s5] sm:$0xff] }
  0x62   : > { %1905 = vmatprep.subr.bf16.mxu0 %v2313_v0  ;;  %1818 = vmatprep.mubr.msk.f32.mxu0 %vm2314_vm0, %v2315_v1  ;;  %v2591_v2 = vld [vmem:[%s523_s27] sm:$0x3]   ;;  %v2601_v4 = vld [vmem:[%s2941_s5 + $0x8] sm:$0xff]  ;;  %v2606_v5 = vld [vmem:[%s2941_s5 + $0x10] sm:$0xff]  ;;  %s2984_s12 = scalar_lea.vmem [#allocation4], %s2560_s24  ;;  %vm618_vm1 = vcmask 261120  }
  0x63   : > { %s596_s28 = scalar_select %p595_p13, %s2434_s22, 1  ;;  %v2611_v6 = vld [vmem:[%s2941_s5 + $0x18] sm:$0xff]  ;;  %v2616_v7 = vld [vmem:[%s2943_s7] sm:$0x1]  ;;  %v608_v9 = vld [vmem:[%s2940_s4 + $0x8] sm:$0xff]  ;;  %vm692_vm2 = vcmask 785408   ;;  %v2295_v19 = vmov %v2591_v2  }
  0x64   : > { %v607_v8 = vld [vmem:[%s2940_s4] sm:$0xff]  ;;  %v609_v10 = vld [vmem:[%s2940_s4 + $0x10] sm:$0xff]  ;;  %v610_v12 = vld [vmem:[%s2940_s4 + $0x18] sm:$0xff]  ;;  %s2985_s20 = sshll.u32 %s2557_s23, 1  ;;  %s594_s16 = scalar_lea.vmem [#allocation12], %s2560_s24 }
  0x65   : > { %s1765_s13 = sshll.u32 %s596_s28, 4  ;;  %s1766_s18 = sshll.u32 %s596_s28, 5  ;;  %v1906_v11 = vpack.c.bf16 %v608_v9, %v607_v8  ;;  %v1909_v13 = vpack.c.bf16 %v610_v12, %v609_v10  ;;  %v606_v14 = vld [vmem:[%s2984_s12] sm:$0xff]  ;;  %v1731_v15 = vld [vmem:[%s2942_s6] ss:$0 sm:$0xff] }
  0x66   : > { %s2584_s21 = scalar_lea.vmem %s2938_s2, %s1765_s13  ;;  %s2589_s26 = scalar_lea.vmem %s2939_s3, %s1766_s18 }
  0x67   : > { %1907 = vmatpush3.bf16.msra.mxu0 %v1906_v11  ;;  %s2641_s25 = scalar_lea.vmem [#allocation10], %s2985_s20  ;;  %s2645_s28 = smov 0  }
  0x68   : > { %1908 = vmatprep.subr.bf16.mxu0 %v2313_v0 }
  0x6b   : > { %1910 = vmatpush3.bf16.msra.mxu0 %v1909_v13 }
  0x6e   : > { %1819 = vmatmul.mubr.msk.f32.vlgmr.msra.gmra.mrb[0].mxu0 %vm618_vm1, %v606_v14 }
 0x141   : > { %v688_v16 = vpop.f32.mrb[0].mxu0 }
 0x142   : > { %v689_v17 = vadd.f32 %v1731_v15, %v688_v16  ;;  %v1820_v18 = vpop.f32.mrb[1].mxu0 }
 0x144   : > { %693 = vst.msk [vmem:[#allocation3] sm:$0xff] %vm692_vm2, %v689_v17 }
 0x145 LB: >> { %v1912_v20 = vpack.c.bf16 %v2601_v4, %v2596_v3  ;;  %v2316_v21 = vmov 0.0|0.0   ;;  %v1915_v22 = vpack.c.bf16 %v2611_v6, %v2606_v5  ;;  %vm2317_vm3 = vmmov 0   ;;  %s2319_s13 = smov 64   ;;  %s706_s17 = scalar_lea.vmem [#allocation3], %s2301_s28  ;;  %s2301_s28 = sphi %s2645_s28, %s704_s28   ;;  %v2297_v19 = vphi %v2295_v19, %v2296_v19  }
 0x146   : >> { %1911 = vmatprep.subr.bf16.mxu0 %v2316_v21  ;;  %v2318_v23 = vmov 0.0   ;;  %s2320_s18 = smov 96   ;;  %s2321_s12 = smov 32   ;;  %vm815_vm4 = vcmask 253952  }
 0x147   : >> { %1913 = vmatpush3.bf16.msra.mxu0 %v1912_v20  ;;  %1829 = vmatprep.mubr.msk.f32.mxu0 %vm2317_vm3, %v2318_v23  ;;  %s814_s27 = scalar_lea.vmem [#allocation2], %s2301_s28  ;;  %s704_s28 = sadd.s32 1, %s2301_s28  }
 0x148   : >> { %1914 = vmatprep.subr.bf16.mxu0 %v2316_v21  ;;  %p701_p3 = scmp.ge.s32.totalorder %s704_s28, 8  }
 0x149   : > { %v1735_v45 = vld [vmem:[%s2940_s4 + $0x20] sm:$0xff] (%p701_p3)  ;;  %v1736_v46 = vld [vmem:[%s2940_s4 + $0x28] sm:$0xff] (%p701_p3)  ;;  %v1737_v47 = vld [vmem:[%s2940_s4 + $0x30] sm:$0xff] (%p701_p3)  ;;  %v913_v55 = vrot.slane (%p701_p3), %v2591_v2, 1  }
 0x14a   : > { %v1918_v48 = vpack.c.bf16 (%p701_p3), %v1736_v46, %v1735_v45  ;;  %v1738_v49 = vld [vmem:[%s2940_s4 + $0x38] sm:$0xff] (%p701_p3)  ;;  %v2686_v52 = vld [vmem:[%s2941_s5 + $0x20] sm:$0xff] (%p701_p3)  ;;  %v2691_v53 = vld [vmem:[%s2941_s5 + $0x28] sm:$0xff] (%p701_p3) }
 0x14b   : >> { %1916 = vmatpush3.bf16.msra.mxu0 %v1915_v22  ;;  %v707_v27 = vld [vmem:[%s706_s17] sm:$0x1]  ;;  %v1921_v50 = vpack.c.bf16 (%p701_p3), %v1738_v49, %v1737_v47  ;;  %v2696_v54 = vld [vmem:[%s2941_s5 + $0x30] sm:$0xff] (%p701_p3)  ;;  %v2702_v56 = vld [vmem:[%s2941_s5 + $0x38] sm:$0xff] (%p701_p3)  ;;  %v2303_v62 = vmov (%p701_p3), %v913_v55  }
 0x14c   : > { %1917 = vmatprep.subr.bf16.mxu0 (%p701_p3), %v2313_v0  ;;  %v2707_v57 = vld [vmem:[%s2943_s7 + $0x1] sm:$0x1] (%p701_p3) }
 0x14d   : > { %v1740_v58 = vld [vmem:[%s2942_s6 + $0x1] ss:$0 sm:$0xff] (%p701_p3) }
 0x14e   : >> { %1830 = vmatmul.mubr.msk.f32.vlgmr.msra.gmra.mrb[0].mxu0 %vm618_vm1, %v2297_v19 }
 0x14f   : > { %1840 = vmatprep.mubr.msk.f32.mxu0 (%p701_p3), %vm2314_vm0, %v2315_v1  ;;  %1919 = vmatpush3.bf16.msra.mxu0 (%p701_p3), %v1918_v48 }
 0x150   : > { %1920 = vmatprep.subr.bf16.mxu0 (%p701_p3), %v2313_v0 }
 0x153   : > { %1922 = vmatpush3.bf16.msra.mxu0 (%p701_p3), %v1921_v50 }
 0x221   : >> { %v777_v24 = vpop.f32.mrb[0].mxu0 }
 0x222   : >> { %v778_v25 = vadd.f32 %v777_v24, %v2616_v7  ;;  %v1831_v26 = vpop.f32.mrb[1].mxu0 }
 0x224   : >> { %789 = vrot.lane.b32.xlu0 %v778_v25, %s2319_s13  ;;  %v781_v28 = vadd.f32 %v778_v25, %v707_v27 }
 0x226   : >> { %v1734_v29 = vmul.f32 -1.442695, %v781_v28 }
 0x228   : >> { %2067 = vpow2.f32 %v1734_v29 }
 0x232   : >> { %v2068_v30 = vpop.eup %2067 }
 0x233   : >> { %v785_v31 = vadd.f32 1.0, %v2068_v30 }
 0x235   : >> { %2069 = vrcp.f32 %v785_v31 }
 0x23f   : >> { %v2070_v32 = vpop.eup %2069 }
 0x240   : >> { %v799_v39 = vsub.f32 1.0, %v2070_v32 }
 0x296   : >> { %v790_v33 = vpop.permute.xlu0 %789 }
 0x297   : >> { %v792_v34 = vmul.f32 %v2070_v32, %v790_v33 }
 0x299   : >> { %794 = vrot.lane.b32.xlu0 %v792_v34, %s2319_s13 }
 0x30b   : >> { %v795_v35 = vpop.permute.xlu0 %794 }
 0x30c   : >> { %v797_v36 = vadd.f32 %v795_v35, %v707_v27 }
 0x30e   : >> { %2071 = vtanh.f32 %v797_v36 }
 0x318   : >> { %v2072_v37 = vpop.eup %2071 }
 0x319   : >> { %801 = vrot.lane.b32.xlu1 %v2072_v37, %s2320_s18 }
 0x31d   : >> { %805 = vrot.lane.b32.xlu1 %v2297_v19, %s2321_s12 }
 0x38b   : >> { %v802_v38 = vpop.permute.xlu1 %801 }
 0x38c   : >> { %v804_v41 = vmul.f32 %v802_v38, %v799_v39 }
 0x38f   : >> { %v806_v40 = vpop.permute.xlu1 %805 }
 0x390   : >> { %v808_v42 = vmul.f32 %v2070_v32, %v806_v40 }
 0x392   : >> { %v809_v43 = vadd.f32 %v808_v42, %v804_v41 }
 0x394   : >> { %811 = vrot.lane.b32.xlu0 %v809_v43, %s2320_s18  ;;  %s2713_s18 = smov (%p701_p3), 0  }
 0x402   : > { %703 = sbr.rel (!%p701_p3) target bundleno = 325 (0x145), region = 190 }
 0x406   : >> { %v2657_v19 = vpop.permute.xlu0 %811  }
 0x407   : >> { %v2986_v44 = vmov %v2657_v19 }
 0x408   : >> { %816 = vst.msk [vmem:[%s814_s27] sm:$0x1] %vm815_vm4, %v2986_v44  ;;  %v2296_v19 = vmov %v2986_v44  }
 0x40f   : > { %v817_v51 = vld [vmem:[#allocation2] sm:$0xff] }
 0x410   : > { %1841 = vmatmul.mubr.msk.f32.vlgmr.msra.gmra.mrb[0].mxu0 %vm618_vm1, %v817_v51 }
 0x4e3   : > { %v900_v59 = vpop.f32.mrb[0].mxu0 }
 0x4e4   : > { %v901_v60 = vadd.f32 %v1740_v58, %v900_v59  ;;  %v1842_v61 = vpop.f32.mrb[1].mxu0 }
 0x4e6   : > { %904 = vst.msk [vmem:[#allocation3] sm:$0xff] %vm692_vm2, %v901_v60 }
 0x4e7 LB: >> { %v1924_v63 = vpack.c.bf16 %v2691_v53, %v2686_v52  ;;  %v2322_v2 = vmov 0.0|0.0   ;;  %v1927_v3 = vpack.c.bf16 %v2702_v56, %v2696_v54  ;;  %vm2323_vm5 = vmmov 0   ;;  %s2325_s12 = smov 64   ;;  %s922_s28 = scalar_lea.vmem [#allocation3], %s2309_s18  ;;  %s2309_s18 = sphi %s2713_s18, %s920_s18   ;;  %v2305_v62 = vphi %v2303_v62, %v2304_v62  }
 0x4e8   : >> { %1923 = vmatprep.subr.bf16.mxu0 %v2322_v2  ;;  %v2324_v4 = vmov 0.0   ;;  %s2326_s27 = smov 96   ;;  %s2327_s29 = smov 32  }
 0x4e9   : >> { %1925 = vmatpush3.bf16.msra.mxu0 %v1924_v63  ;;  %1851 = vmatprep.mubr.msk.f32.mxu0 %vm2323_vm5, %v2324_v4  ;;  %s1030_s20 = scalar_lea.vmem [#allocation2], %s2309_s18  ;;  %s920_s18 = sadd.s32 1, %s2309_s18  }
 0x4ea   : >> { %1926 = vmatprep.subr.bf16.mxu0 %v2322_v2  ;;  %p917_p7 = scmp.ge.s32.totalorder %s920_s18, 8  }
 0x4eb   : > { %v1043_v26 = vld [vmem:[%s2589_s26] sm:$0xff] (%p917_p7)  ;;  %v1044_v27 = vld [vmem:[%s2589_s26 + $0x8] sm:$0xff] (%p917_p7)  ;;  %v1045_v28 = vld [vmem:[%s2589_s26 + $0x10] sm:$0xff] (%p917_p7)  ;;  %1935 = vmatprep.subr.bf16.mxu1 (%p917_p7), %v2313_v0  ;;  %1869 = vmatprep.mubr.msk.f32.mxu1 (%p917_p7), %vm2314_vm0, %v2315_v1  ;;  %vm1121_vm6 = vcmask (%p917_p7), 97280   ;;  %vm1136_vm7 = vcmask (%p917_p7), 1043456   ;;  %vm2328_vm8 = vmmov (%p917_p7), 1  }
 0x4ec   : > { %v1930_v29 = vpack.c.bf16 (%p917_p7), %v1044_v27, %v1043_v26  ;;  %v1046_v30 = vld [vmem:[%s2589_s26 + $0x18] sm:$0xff] (%p917_p7)  ;;  %v1041_v42 = vld [vmem:[%s2584_s21] sm:$0xff] (%p917_p7)  ;;  %v1042_v43 = vld [vmem:[%s2584_s21 + $0x8] sm:$0xf] (%p917_p7)  ;;  %v2329_v61 = vmov (%p917_p7), 0   ;;  %vm1036_vm11 = vcmask (%p917_p7), 1040384  }
 0x4ed   : >> { %1928 = vmatpush3.bf16.msra.mxu0 %v1927_v3  ;;  %v923_v8 = vld [vmem:[%s922_s28] sm:$0x1]  ;;  %v1933_v31 = vpack.c.bf16 (%p917_p7), %v1046_v30, %v1045_v28  ;;  %v1936_v45 = vpack.c.bf16 (%p917_p7), %v1042_v43, %v1041_v42  ;;  %vm1937_vm9 = vmpackc.low (%p917_p7), %vm1136_vm7, %vm2328_vm8  ;;  %v1213_v47 = vld [vmem:[%s2944_s8 + $0x8] sm:$0xff] (%p917_p7)  ;;  %2079 = vset.pattern.permute.xlu1 (%p917_p7), %v2329_v61  ;;  %vm1038_vm12 = vcmask (%p917_p7), 254976   ;;  %s1471_s21 = sand.u32 (%p917_p7), 1, %s2434_s22   ;;  %s1503_s13 = sshll.u32 (%p917_p7), %s2641_s25, 4  ;;  %s2823_s13 = int_to_ptr.vmem [resolvable:$true] %s1503_s13 }
 0x4ee   : > { %1929 = vmatprep.subr.bf16.mxu0 (%p917_p7), %v2313_v0  ;;  %v1212_v46 = vld [vmem:[%s2944_s8] sm:$0xff] (%p917_p7)  ;;  %v1214_v49 = vld [vmem:[%s2944_s8 + $0x10] sm:$0xff] (%p917_p7)  ;;  %v1215_v50 = vld [vmem:[%s2944_s8 + $0x18] sm:$0xff] (%p917_p7)  ;;  %2080 = vset.pattern.permute.xlu0 (%p917_p7), %v2329_v61  ;;  %s1760_s17 = sshll.u32 (%p917_p7), %s2434_s22, 7  ;;  %s2826_s18 = scalar_lea.sflag (%p917_p7), [#allocation11], %s1471_s21 }
 0x4ef   : > { %1938 = vmatpush3.bf16.msk.msra.mxu1 (%p917_p7), %vm1937_vm9, %v1936_v45  ;;  %v1946_v48 = vpack.c.bf16 (%p917_p7), %v1213_v47, %v1212_v46  ;;  %v1949_v51 = vpack.c.bf16 (%p917_p7), %v1215_v50, %v1214_v49  ;;  %v1216_v53 = vld [vmem:[%s2945_s9] sm:$0xff] (%p917_p7)  ;;  %v1217_v54 = vld [vmem:[%s2945_s9 + $0x8] sm:$0xff] (%p917_p7)  ;;  %v1218_v58 = vld [vmem:[%s2945_s9 + $0x10] sm:$0xff] (%p917_p7)  ;;  %p2988_p8 = scmp.ne.s32.totalorder (%p917_p7), %s2974_s30, 0  ;;  %s2330_s28 = smov (%p917_p7), [#allocation10]  }
 0x4f0   : >> { %1852 = vmatmul.mubr.msk.f32.vlgmr.msra.gmra.mrb[0].mxu0 %vm618_vm1, %v2305_v62  ;;  %1939 = vmatprep.subr.bf16.mxu1 (%p917_p7), %v2313_v0  ;;  %v1940_v56 = vpack.c.bf16 (%p917_p7), %v1217_v54, %v1216_v53  ;;  %v1219_v59 = vld [vmem:[%s2945_s9 + $0x18] sm:$0xff] (%p917_p7)  ;;  %s2151_s0 = sshll.u32 (%p917_p7), %s2330_s28, 4  ;;  %s2152_s0 = int_to_ptr.vmem [resolvable:$false] %s2151_s0 }
 0x4f1   : > { %1862 = vmatprep.mubr.msk.f32.mxu0 (%p917_p7), %vm2314_vm0, %v2315_v1  ;;  %1931 = vmatpush3.bf16.msra.mxu0 (%p917_p7), %v1930_v29  ;;  %v1943_v60 = vpack.c.bf16 (%p917_p7), %v1219_v59, %v1218_v58  ;;  %p2154_p1 = scmp.lt.s32.totalorder (%p917_p7), %s2823_s13, %s2152_s0 }
 0x4f2   : > { %1932 = vmatprep.subr.bf16.mxu0 (%p917_p7), %v2313_v0 }
 0x4f5   : > { %1934 = vmatpush3.bf16.msra.mxu0 (%p917_p7), %v1933_v31 }
 0x4f6   : > { %1945 = vmatprep.subr.bf16.mxu0 (%p917_p7), %v2313_v0 }
 0x5c3   : >> { %v993_v5 = vpop.f32.mrb[0].mxu0 }
 0x5c4   : >> { %v994_v6 = vadd.f32 %v2707_v57, %v993_v5  ;;  %v1853_v7 = vpop.f32.mrb[1].mxu0  ;;  %v1378_v5 = vld [vmem:[%s2947_s11] sm:$0xff] (%p917_p7) }
 0x5c6   : >> { %1005 = vrot.lane.b32.xlu0 %v994_v6, %s2325_s12  ;;  %v997_v9 = vadd.f32 %v994_v6, %v923_v8  ;;  %v1379_v6 = vld [vmem:[%s2947_s11 + $0x8] sm:$0xff] (%p917_p7) }
 0x5c7   : > { %v1952_v7 = vpack.c.bf16 (%p917_p7), %v1379_v6, %v1378_v5 }
 0x5c8   : >> { %v1748_v10 = vmul.f32 -1.442695, %v997_v9 }
 0x5ca   : >> { %2073 = vpow2.f32 %v1748_v10 }
 0x5d4   : >> { %v2074_v11 = vpop.eup %2073 }
 0x5d5   : >> { %v1001_v12 = vadd.f32 1.0, %v2074_v11  ;;  %v1754_v11 = vld [vmem:[%s2946_s10] ss:$0 sm:$0xff] (%p917_p7) }
 0x5d7   : >> { %2075 = vrcp.f32 %v1001_v12 }
 0x5e1   : >> { %v2076_v13 = vpop.eup %2075 }
 0x5e2   : >> { %v1015_v20 = vsub.f32 1.0, %v2076_v13 }
 0x638   : >> { %v1006_v14 = vpop.permute.xlu0 %1005 }
 0x639   : >> { %v1008_v15 = vmul.f32 %v2076_v13, %v1006_v14 }
 0x63b   : >> { %1010 = vrot.lane.b32.xlu0 %v1008_v15, %s2325_s12  ;;  %s2147_s12 = scalar_lea.vmem (%p917_p7), %s2823_s13, 32 }
 0x63c   : > { %p2148_p5 = scmp.ne.s32.totalorder (%p917_p7), %s2823_s13, %s2147_s12 }
 0x63e   : > { %p2149_p9 = pnand (%p917_p7), %p2148_p5, %p2988_p8 }
 0x640   : > { %p2150_p0 = pneg (%p917_p7), %p2149_p9 }
 0x6ad   : >> { %v1011_v16 = vpop.permute.xlu0 %1010 }
 0x6ae   : >> { %v1013_v17 = vadd.f32 %v1011_v16, %v923_v8  ;;  %v1380_v8 = vld [vmem:[%s2947_s11 + $0x10] sm:$0xff] (%p917_p7) }
 0x6b0   : >> { %2077 = vtanh.f32 %v1013_v17 }
 0x6ba   : >> { %v2078_v18 = vpop.eup %2077 }
 0x6bb   : >> { %1017 = vrot.lane.b32.xlu1 %v2078_v18, %s2326_s27 }
 0x6bf   : >> { %1021 = vrot.lane.b32.xlu1 %v2305_v62, %s2327_s29  ;;  %s2153_s29 = scalar_lea.vmem (%p917_p7), %s2152_s0, 64 }
 0x6c0   : > { %p2155_p11 = scmp.lt.s32.totalorder (%p917_p7), %s2153_s29, %s2147_s12 }
 0x6c2   : > { %p2156_p12 = por (%p917_p7), %p2155_p11, %p2154_p1 }
 0x6c4   : > { %p2157_p2 = pnand (%p917_p7), %p2156_p12, %p2150_p0 }
 0x72d   : >> { %v1018_v19 = vpop.permute.xlu1 %1017 }
 0x72e   : >> { %v1020_v22 = vmul.f32 %v1018_v19, %v1015_v20 }
 0x731   : >> { %v1022_v21 = vpop.permute.xlu1 %1021 }
 0x732   : >> { %v1024_v23 = vmul.f32 %v2076_v13, %v1022_v21 }
 0x734   : >> { %v1025_v24 = vadd.f32 %v1024_v23, %v1020_v22 }
 0x736   : >> { %1027 = vrot.lane.b32.xlu0 %v1025_v24, %s2326_s27  ;;  %s1761_s27 = sshll.u32 (%p917_p7), %s2434_s22, 5 }
 0x737   : > { %s2820_s26 = scalar_lea.hbm (%p917_p7), %s2950_s14, %s1761_s27 }
 0x7a4   : > { %919 = sbr.rel (!%p917_p7) target bundleno = 1255 (0x4e7), region = 201 }
 0x7a8   : >> { %v2725_v62 = vpop.permute.xlu0 %1027  }
 0x7a9   : >> { %v2987_v25 = vmov %v2725_v62 }
 0x7aa   : >> { %1032 = vst.msk [vmem:[%s1030_s20] sm:$0x1] %vm815_vm4, %v2987_v25  ;;  %v2304_v62 = vmov %v2987_v25   ;;  %v1034_v17 = vrot.slane (%p917_p7), %v2987_v25, 7 }
 0x7ac   : > { %v1037_v18 = vsel %vm1036_vm11, %v2986_v44, %v1034_v17 }
 0x7ad   : > { %1039 = vst.msk [vmem:[%s2641_s25] sm:$0x3] %vm1038_vm12, %v1037_v18 }
 0x7b1   : > { %v1040_v32 = vld [vmem:[#allocation2] sm:$0xff] }
 0x7b2   : > { %1863 = vmatmul.mubr.msk.f32.vlgmr.msra.gmra.mrb[0].mxu0 %vm618_vm1, %v1040_v32  ;;  %vm1210_vm10 = vcmp.ne.f32.partialorder %v1040_v32, 0.0 }
 0x7b3   : > { %1891 = vmatprep.mubr.msk.f32.mxu0 %vm2314_vm0, %v2315_v1  ;;  %1947 = vmatpush3.bf16.msra.mxu0 %v1946_v48  ;;  %v1211_v62 = vsel %vm1210_vm10, 1.0, %v2315_v1 }
 0x7b4   : > { %1948 = vmatprep.subr.bf16.mxu0 %v2313_v0  ;;  %1374 = vperm.xlu1 %2079, %v1211_v62  }
 0x7b7   : > { %1950 = vmatpush3.bf16.msra.mxu0 %v1949_v51 }
 0x7ba   : > { %1892 = vmatmul.mubr.msk.f32.vlgmr.msra.gmra.mrb[2].mxu0 %vm618_vm1, %v1040_v32 }
 0x833   : > { %v2808_v14 = vpop.permute.xlu1 %1374 }
 0x885   : > { %v1116_v33 = vpop.f32.mrb[0].mxu0 }
 0x886   : > { %v1120_v34 = vmul.f32 0.17677669, %v1116_v33  ;;  %v1864_v35 = vpop.f32.mrb[1].mxu0 }
 0x888   : > { %v1122_v36 = vsel %vm1121_vm6, %v1120_v34, -inf }
 0x889   : > { %1123 = vmax.xlane.f32.xlu0 %v1122_v36 }
 0x88d   : > { %v1359_v63 = vpop.f32.mrb[2].mxu0 }
 0x88e   : > { %v1893_v2 = vpop.f32.mrb[3].mxu0 }
 0x916   : > { %v1124_v37 = vpop.xlane.xlu0 %1123 }
 0x917   : > { %v1125_v38 = vsub.f32 %v1120_v34, %v1124_v37 }
 0x919   : > { %v1126_v39 = vmul.f32 1.442695, %v1125_v38 }
 0x91b   : > { %2081 = vpow2.f32 %v1126_v39 }
 0x925   : > { %v2082_v40 = vpop.eup %2081 }
 0x926   : > { %v1128_v41 = vsel %vm1121_vm6, %v2082_v40, 0.0 }
 0x927   : > { %1129 = vadd.xlane.f32.xlu0 %v1128_v41 }
 0x9b4   : > { %v1130_v52 = vpop.xlane.xlu0 %1129 }
 0x9b5   : > { %2083 = vrcp.f32 %v1130_v52 }
 0x9bf   : > { %v2084_v55 = vpop.eup %2083 }
 0x9c0   : > { %v1132_v57 = vmul.f32 %v2084_v55, %v2082_v40 }
 0x9c2   : > { %1870 = vmatmul.mubr.msk.f32.vlgmr.msra.gmra.mrb[0].mxu1 %vm1121_vm6, %v1132_v57  ;;  %1465 = vst.msk [vmem:[%s594_s16] sm:$0xff] %vm1121_vm6, %v1132_v57 }
 0x9c3   : > { %1941 = vmatpush3.bf16.msra.mxu1 %v1940_v56  ;;  %1880 = vmatprep.mubr.msk.f32.mxu1 %vm2314_vm0, %v2315_v1 }
 0x9c4   : > { %1942 = vmatprep.subr.bf16.mxu1 %v2313_v0 }
 0x9c7   : > { %1944 = vmatpush3.bf16.msra.mxu1 %v1943_v60 }
 0x9c8   : > { %1951 = vmatprep.subr.bf16.mxu1 %v2313_v0 }
 0xa95   : > { %v1206_v3 = vpop.f32.mrb[0].mxu1 }
 0xa96   : > { %v1871_v4 = vpop.f32.mrb[1].mxu1  ;;  %1881 = vmatmul.mubr.msk.f32.vlgmr.msra.gmra.mrb[2].mxu1 %vm618_vm1, %v1206_v3 }
 0xa97   : > { %1902 = vmatprep.mubr.msk.f32.mxu1 %vm2314_vm0, %v2315_v1  ;;  %1953 = vmatpush3.bf16.msra.mxu1 %v1952_v7  ;;  %v1381_v1 = vld [vmem:[%s2947_s11 + $0x18] sm:$0xff] }
 0xa98   : > { %1954 = vmatprep.subr.bf16.mxu1 %v2313_v0  ;;  %v1955_v9 = vpack.c.bf16 %v1381_v1, %v1380_v8 }
 0xa9b   : > { %1956 = vmatpush3.bf16.msra.mxu1 %v1955_v9 }
 0xb69   : > { %v1289_v10 = vpop.f32.mrb[2].mxu1 }
 0xb6a   : > { %v1360_v12 = vadd.f32 %v1359_v63, %v1289_v10  ;;  %v1882_v0 = vpop.f32.mrb[3].mxu1 }
 0xb6c   : > { %v1370_v13 = vadd.f32 %v1754_v11, %v1360_v12 }
 0xb6e   : > { %2085 = vtanh.f32 %v1370_v13 }
 0xb78   : > { %v2086_v15 = vpop.eup %2085 }
 0xb79   : > { %v1377_v16 = vmul.f32 %v2086_v15, %v2808_v14 }
 0xb7b   : > { %1903 = vmatmul.mubr.msk.f32.vlgmr.msra.gmra.mrb[4].mxu1 %vm618_vm1, %v1377_v16 }
 0xb7c   : > { %2160 = shalt.err (!%p2157_p2)
}
 0xb7d   : > { %s2161_s25 = scalar_lea.hbm %s2820_s26, 32  ;;  %s2165_s20 = scalar_lea.hbm %s2950_s14, 64 }
 0xb7e   : > { %p2162_p4 = scmp.ne.s32.totalorder %s2820_s26, %s2161_s25  ;;  %p2166_p13 = scmp.lt.u32.totalorder %s2820_s26, %s2950_s14 }
 0xb7f   : > { %p2167_p3 = scmp.lt.u32.totalorder %s2165_s20, %s2161_s25  ;;  %p2169_p5 = scmp.lt.u32.totalorder %s2161_s25, %s2820_s26 }
 0xb80   : > { %p2163_p10 = pnand %p2162_p4, %p2988_p8 }
 0xb81   : > { %p2168_p7 = por %p2167_p3, %p2166_p13 }
 0xb82   : > { %p2164_p6 = pneg %p2163_p10 }
 0xb83   : > { %p2170_p9 = por %p2169_p5, %p2168_p7 }
 0xb85   : > { %p2171_p0 = pnand %p2170_p9, %p2164_p6 }
 0xb87   : > { %2174 = shalt.err (!%p2171_p0)
}
 0xb88   : > { %1962 = dma.vmem_to_hbm [thread:$0]  (%p2988_p8), %s2823_s13, 32, %s2820_s26, %s2826_s18  }
 0xb89   : > { %s2855_s21 = scalar_lea.hbm %s2951_s15, %s1760_s17  ;;  %s1516_s25 = sshll.u32 %s594_s16, 4  ;;  %s1517_s25 = int_to_ptr.vmem [resolvable:$true] %s1516_s25 }
 0xb8a   : > { %s2175_s27 = scalar_lea.vmem %s1517_s25, 128  ;;  %s2331_s20 = smov [#allocation12]  }
 0xb8b   : > { %p2176_p1 = scmp.ne.s32.totalorder %s1517_s25, %s2175_s27  ;;  %s2179_s28 = sshll.u32 %s2331_s20, 4  ;;  %s2180_s28 = int_to_ptr.vmem [resolvable:$false] %s2179_s28 }
 0xb8c   : > { %s2181_s0 = scalar_lea.vmem %s2180_s28, 256  ;;  %p2182_p2 = scmp.lt.s32.totalorder %s1517_s25, %s2180_s28 }
 0xb8d   : > { %p2177_p11 = pnand %p2176_p1, %p2988_p8  ;;  %p2183_p4 = scmp.lt.s32.totalorder %s2181_s0, %s2175_s27 }
 0xb8f   : > { %p2178_p12 = pneg %p2177_p11  ;;  %p2184_p10 = por %p2183_p4, %p2182_p2 }
 0xb91   : > { %p2185_p6 = pnand %p2184_p10, %p2178_p12 }
 0xb93   : > { %2188 = shalt.err (!%p2185_p6)
}
 0xb94   : > { %s2189_s16 = scalar_lea.hbm %s2855_s21, 128  ;;  %s2193_s12 = scalar_lea.hbm %s2951_s15, 256 }
 0xb95   : > { %p2190_p13 = scmp.ne.s32.totalorder %s2855_s21, %s2189_s16  ;;  %p2194_p5 = scmp.lt.u32.totalorder %s2855_s21, %s2951_s15 }
 0xb96   : > { %p2195_p9 = scmp.lt.u32.totalorder %s2193_s12, %s2189_s16  ;;  %p2197_p1 = scmp.lt.u32.totalorder %s2189_s16, %s2855_s21 }
 0xb97   : > { %p2191_p3 = pnand %p2190_p13, %p2988_p8 }
 0xb98   : > { %p2196_p0 = por %p2195_p9, %p2194_p5 }
 0xb99   : > { %p2192_p7 = pneg %p2191_p3 }
 0xb9a   : > { %p2198_p11 = por %p2197_p1, %p2196_p0 }
 0xb9c   : > { %p2199_p12 = pnand %p2198_p11, %p2192_p7 }
 0xb9e   : > { %2202 = shalt.err (!%p2199_p12)
}
 0xb9f   : > { %1963 = dma.vmem_to_hbm [thread:$0]  (%p2988_p8), %s1517_s25, 128, %s2855_s21, %s2826_s18   ;;  %vm1463_vm13 = vcmask 130048  }
 0xba0   : > { %s2989_s0 = sld [smem:[#allocation24_spill]]  ;;  %s2990_s26 = scalar_lea.vmem [#allocation9], %s2560_s24 }
 0xba1   : > { %s1490_s16 = sshll.u32 %s2990_s26, 4  ;;  %s2991_s29 = sld [smem:[#allocation25_spill]]  ;;  %s2890_s16 = int_to_ptr.vmem [resolvable:$true] %s1490_s16 }
 0xba2   : > { %s2992_s18 = smov %s2990_s26  ;;  %s1467_s21 = scalar_lea.sflag [#allocation6], %s2557_s23 }
 0xba3   : > { %s2203_s25 = scalar_lea.vmem %s2890_s16, 128  ;;  %s2332_s27 = smov [#allocation9]  }
 0xba4   : > { %p2204_p2 = scmp.ne.s32.totalorder %s2890_s16, %s2203_s25  ;;  %s2207_s22 = sshll.u32 %s2332_s27, 4  ;;  %s2208_s22 = int_to_ptr.vmem [resolvable:$false] %s2207_s22 }
 0xba5   : > { %s2209_s28 = scalar_lea.vmem %s2208_s22, 256  ;;  %p2210_p6 = scmp.lt.s32.totalorder %s2890_s16, %s2208_s22 }
 0xba6   : > { %v1755_v44 = vld [vmem:[%s2989_s0] ss:$0 sm:$0xff]  ;;  %p2205_p4 = pnand %p2204_p2, %p2988_p8  ;;  %p2211_p13 = scmp.lt.s32.totalorder %s2209_s28, %s2203_s25 }
 0xba7   : > { %s2888_s20 = scalar_lea.hbm %s2991_s29, %s1760_s17 }
 0xba8   : > { %p2206_p10 = pneg %p2205_p4  ;;  %p2212_p3 = por %p2211_p13, %p2210_p6 }
 0xbaa   : > { %p2213_p7 = pnand %p2212_p3, %p2206_p10 }
 0xc4e   : > { %v1458_v19 = vpop.f32.mrb[4].mxu1 }
 0xc4f   : > { %v1459_v20 = vadd.f32 %v1755_v44, %v1458_v19  ;;  %v1904_v21 = vpop.f32.mrb[5].mxu1 }
 0xc51   : > { %v1462_v22 = vmul.f32 %v1459_v20, %v2808_v14 }
 0xc53   : > { %1464 = vst.msk [vmem:[%s2992_s18] sm:$0xff] %vm1463_vm13, %v1462_v22 }
 0xc54   : > { %2216 = shalt.err (!%p2213_p7)
}
 0xc55   : > { %s2217_s23 = scalar_lea.hbm %s2888_s20, 128  ;;  %s2221_s0 = scalar_lea.hbm %s2991_s29, 256 }
 0xc56   : > { %p2218_p5 = scmp.ne.s32.totalorder %s2888_s20, %s2217_s23  ;;  %p2222_p1 = scmp.lt.u32.totalorder %s2888_s20, %s2991_s29 }
 0xc57   : > { %p2223_p11 = scmp.lt.u32.totalorder %s2221_s0, %s2217_s23  ;;  %p2225_p2 = scmp.lt.u32.totalorder %s2217_s23, %s2888_s20 }
 0xc58   : > { %p2219_p9 = pnand %p2218_p5, %p2988_p8 }
 0xc59   : > { %p2224_p12 = por %p2223_p11, %p2222_p1 }
 0xc5a   : > { %p2220_p0 = pneg %p2219_p9 }
 0xc5b   : > { %p2226_p4 = por %p2225_p2, %p2224_p12 }
 0xc5d   : > { %p2227_p10 = pnand %p2226_p4, %p2220_p0 }
 0xc5f   : > { %2230 = shalt.err (!%p2227_p10)
}
 0xc60   : > { %1961 = dma.vmem_to_hbm [thread:$0]  (%p2988_p8), %s2890_s16, 128, %s2888_s20, %s1467_s21  }
 0xc61 PF: > { %s2993_s12 = sld [smem:[#allocation17_spill]]  ;;  %s2994_s18 = sld [smem:[#allocation22_spill]] }
 0xc62   : > { %s2995_s25 = sld [smem:[#allocation19_spill]] }
 0xc67   : > { %s1528_s27 = sand.u32 1, %s2993_s12   ;;  %p2996_p6 = scmp.ne.s32.totalorder %s2994_s18, 0 }
 0xc68   : > { %p2997_p13 = scmp.ge.s32.totalorder %s2995_s25, 2  ;;  %s1529_s22 = scalar_lea.sflag [#allocation6], %s1528_s27 }
 0xc6a   : > { %p1975_p3 = pnand %p2997_p13, %p2996_p6 }
 0xc6c   : > { %2272 = dma.done.wait (!%p1975_p3), %s1529_s22, 128  }
 0xc6d   : > { %2274 = vsyncadd (!%p1975_p3), %s1529_s22, 4294967168  ;;  %s2998_s28 = sadd.s32 4294967294, %s2995_s25  }
 0xc6e   : > { %s1537_s23 = sand.u32 1, %s2998_s28  }
 0xc6f   : > { %s1538_s24 = scalar_lea.sflag [#allocation11], %s1537_s23 }
 0xc70   : > { %2276 = dma.done.wait (!%p1975_p3), %s1538_s24, 160  }
 0xc71   : > { %2278 = vsyncadd (!%p1975_p3), %s1538_s24, 4294967136  ;;  %s2999_s21 = sld [smem:[#allocation20_spill]]  ;;  %s3000_s30 = sld [smem:[#allocation18_spill]] }
 0xc72   : > { %s3001_s20 = sld [smem:[#allocation21_spill]]  ;;  %s3002_s18 = smov %s2285_s19 }
 0xc77   : > { %p35_p8 = scmp.ge.s32.totalorder %s2999_s21, 4   ;;  %s3003_s19 = smov %s3000_s30 }
 0xc79   :  { %37 = sbr.rel (!%p35_p8) target bundleno = 13 (0xd), region = 212 }
 0xc80   :  { %1552 = vsyncpa [#allocation5], 1 }
 0xc81   :  { %1554 = vsyncpa [#allocation5 + $0x1], 1 }
 0xc82   :  { %1555 = vsyncpa [#allocation8], 1 }
 0xc83   :  { %1557 = vsyncpa [#allocation8 + $0x1], 1 }
 0xc84   :  { %1558 = vsyncpa [#allocation6], 1 }
 0xc85   :  { %1560 = vsyncpa [#allocation6 + $0x1], 1 }
 0xc86   :  { %1561 = vsyncpa [#allocation11], 1 }
 0xc87   :  { %1563 = vsyncpa [#allocation11 + $0x1], 1 }

</bundles_post_ra>
